<compile_context>
chip_gen: v7x
topology: tpu7x:2x2x1
jax: 0.10.0
libtpu: 0.0.40
codegen_flags: <defaults>
</compile_context>

<pallas_src>
import functools

import jax
import jax.numpy as jnp
from jax import lax
from jax.experimental import pallas as pl
from jax.experimental.pallas import tpu as pltpu


def _round_up(v, m):
    return (v + m - 1) // m * m


def _pad2(a, rows, cols):
    return jnp.pad(a, ((0, rows - a.shape[0]), (0, cols - a.shape[1])))


def _pick_vmem_limit():
    """Scoped-VMEM cap: above the 16/32 MiB defaults, below physical VMEM."""
    try:
        cap = int(pltpu.get_tpu_info().vmem_capacity_bytes)
    except Exception:
        cap = 64 * 1024 * 1024          # conservative (v7x per-core physical)
    return min(cap * 3 // 4, 100 * 1024 * 1024)


# ---------------------------------------------------------------------------
# Fused kernel body.  Grid point (d, t, e):
#   d = direction (0 fpa / 1 bpa), t = radial step, e = E-tile.
# ---------------------------------------------------------------------------
def giph_fused_kernel(
    x_ref, ef_ref,
    nt_w1_ref, nt_b1_ref, nt_w2_ref, nt_b2_ref,
    gather_ref, scatter_ref, deginv_ref, mask_ref,
    wpa_ref, wpb_ref, bpre_ref, wupd_ref, bupd_ref,
    out_ref,
    st_ref, y_ref, zacc_ref,
):
    f32 = jnp.float32
    bf16 = jnp.bfloat16
    t = pl.program_id(1)
    e = pl.program_id(2)
    n_e = pl.num_programs(2)

    # -- per-direction init: node_transform -> self_trans, y0 = self_trans ----
    @pl.when((t == 0) & (e == 0))
    def _():
        h1 = jnp.maximum(
            jnp.dot(x_ref[...], nt_w1_ref[...], preferred_element_type=f32)
            + nt_b1_ref[...],
            0.0,
        )
        st = (jnp.dot(h1, nt_w2_ref[...], preferred_element_type=f32)
              + nt_b2_ref[...])                                  # (Np, Hp)
        st_ref[...] = st
        y_ref[...] = st

    # -- per-radial-step init: zero the scatter accumulator -------------------
    @pl.when(e == 0)
    def _():
        zacc_ref[...] = jnp.zeros_like(zacc_ref)

    # -- streamed E-tile: gather -> message -> partial scatter-accumulate -----
    g = gather_ref[0]                          # (tE, Np) bf16 (exact 0/1)
    s = scatter_ref[0]                         # (tE, Np) bf16 (exact 0/1)
    y_b = y_ref[...].astype(bf16)              # bf16 MXU operand, f32 state kept

    src_y = jnp.dot(g, y_b, preferred_element_type=f32)          # (tE, Hp)
    e_pre = (jnp.dot(ef_ref[...], wpb_ref[0], preferred_element_type=f32)
             + bpre_ref[0])                                      # (tE, HDp)
    msg = jnp.maximum(
        jnp.dot(src_y, wpa_ref[0], preferred_element_type=f32) + e_pre, 0.0
    )                                                            # (tE, HDp)

    # scatter-sum: contract over the E-tile axis; transposed LHS is MXU-native
    # (no materialized (E,N) transpose), both operands bf16, f32 accumulation.
    zacc_ref[...] += lax.dot_general(
        s, msg.astype(bf16), (((0,), (0,)), ((), ())),
        preferred_element_type=f32,
    )                                                            # (Np, HDp)

    # -- per-radial-step finalize: mean, update layer, residual, sink mask ----
    @pl.when(e == n_e - 1)
    def _():
        z = zacc_ref[...] * deginv_ref[0]                        # (Np, HDp)
        h = jnp.maximum(
            jnp.dot(z, wupd_ref[0], preferred_element_type=f32) + bupd_ref[0],
            0.0,
        )                                                        # (Np, Hp)
        y_new = st_ref[...] + mask_ref[0] * h                    # sink zeroed
        y_ref[...] = y_new
        out_ref[...] = y_new        # HBM writeback only when d changes / end


# ---------------------------------------------------------------------------
# Wrapper: pads to tile-friendly shapes, builds dense bf16 gather/scatter
# operators, and issues a single fused pallas_call.
# ---------------------------------------------------------------------------
def giph_embedding_radial(x, edge_feat, src, dst, params, k, *, e_tile=512):
    """Full GiPHEmbedding_radial forward.  Returns (N, out_dim)."""
    assert k >= 1
    f32 = jnp.float32
    bf16 = jnp.bfloat16

    N, node_dim = x.shape
    E, edge_dim = edge_feat.shape
    H = params["nt_w2"].shape[1]
    HD = H + edge_dim

    # Padded sizes: lanes to 128, bf16 sublanes (E) to 16.
    Np = _round_up(N, 128)
    Hp = _round_up(H, 128)
    HDp = _round_up(HD, 128)
    tE = min(e_tile, _round_up(E, 16))
    Ep = _round_up(E, tE)
    nE = Ep // tE

    # One-hot gather/scatter matrices in bf16 (0/1 exact).  Padded edge rows
    # are all-zero -> contribute nothing; padded node columns never selected.
    src1h = jnp.pad(jax.nn.one_hot(src, Np, dtype=bf16), ((0, Ep - E), (0, 0)))
    dst1h = jnp.pad(jax.nn.one_hot(dst, Np, dtype=bf16), ((0, Ep - E), (0, 0)))

    in_deg = jnp.zeros((Np,), f32).at[dst].add(1.0)              # fwd in-degree
    out_deg = jnp.zeros((Np,), f32).at[src].add(1.0)             # rev in-degree

    def _inv(d):
        return jnp.where(d > 0, 1.0 / jnp.maximum(d, 1.0), 0.0)[:, None]

    deginv = jnp.stack([_inv(in_deg), _inv(out_deg)], axis=0)    # (2, Np, 1)

    mask_f = jnp.ones((Np, 1), f32).at[N - 1, 0].set(0.0)        # fpa sink
    mask_b = jnp.ones((Np, 1), f32).at[0, 0].set(0.0)            # bpa sink
    mask = jnp.stack([mask_f, mask_b], axis=0)                   # (2, Np, 1)

    # direction 0 = fpa (gather src, scatter dst), direction 1 = bpa (reversed)
    gather = jnp.stack([src1h, dst1h], axis=0)                   # (2, Ep, Np)
    scatter = jnp.stack([dst1h, src1h], axis=0)                  # (2, Ep, Np)

    xp = jnp.pad(x, ((0, Np - N), (0, 0)))                       # (Np, nd)
    efp = jnp.pad(edge_feat, ((0, Ep - E), (0, 0)))              # (Ep, De)

    # Zero-padded weights (zero rows/cols are inert -> identical semantics).
    nt_w1, nt_b1 = params["nt_w1"], params["nt_b1"]
    nt_w2 = _pad2(params["nt_w2"], node_dim, Hp)
    nt_b2 = _pad2(params["nt_b2"], 1, Hp)

    def pad_agg(p):
        return (
            _pad2(p["wpre_a"], Hp, HDp),      # (Hp, HDp)
            _pad2(p["wpre_b"], edge_dim, HDp),
            _pad2(p["bpre"], 1, HDp),
            _pad2(p["wupd"], HDp, Hp),
            _pad2(p["bupd"], 1, Hp),
        )

    fpa_w = pad_agg(params["fpa"])
    bpa_w = pad_agg(params["bpa"])
    wpa, wpb, bpre, wupd, bupd = (
        jnp.stack([a, b], axis=0) for a, b in zip(fpa_w, bpa_w)
    )

    # --- BlockSpecs ----------------------------------------------------------
    def rep_spec(a):      # whole array, same block at every grid point
        nd = a.ndim
        return pl.BlockSpec(a.shape, lambda d, t, e, _n=nd: (0,) * _n)

    def dir_spec(a):      # (2, ...) -> one per-direction block of shape (1,...)
        tail = a.shape[1:]
        nt = len(tail)
        return pl.BlockSpec((1,) + tail,
                            lambda d, t, e, _n=nt: (d,) + (0,) * _n)

    onehot_spec = pl.BlockSpec((1, tE, Np), lambda d, t, e: (d, e, 0))
    ef_spec = pl.BlockSpec((tE, edge_dim), lambda d, t, e: (e, 0))

    out_p = pl.pallas_call(
        giph_fused_kernel,
        out_shape=jax.ShapeDtypeStruct((Np, 2 * Hp), f32),
        grid=(2, k, nE),
        in_specs=[
            rep_spec(xp), ef_spec,
            rep_spec(nt_w1), rep_spec(nt_b1), rep_spec(nt_w2), rep_spec(nt_b2),
            onehot_spec, onehot_spec,
            dir_spec(deginv), dir_spec(mask),
            dir_spec(wpa), dir_spec(wpb), dir_spec(bpre),
            dir_spec(wupd), dir_spec(bupd),
        ],
        out_specs=pl.BlockSpec((Np, Hp), lambda d, t, e: (0, d)),
        scratch_shapes=[
            pltpu.VMEM((Np, Hp), f32),     # self_trans (per direction)
            pltpu.VMEM((Np, Hp), f32),     # y state carried across k steps
            pltpu.VMEM((Np, HDp), f32),    # scatter-sum accumulator (f32)
        ],
        compiler_params=pltpu.CompilerParams(
            dimension_semantics=("parallel", "arbitrary", "arbitrary"),
            vmem_limit_bytes=_pick_vmem_limit(),
        ),
    )(
        xp, efp,
        nt_w1, nt_b1, nt_w2, nt_b2,
        gather, scatter, deginv, mask, wpa, wpb, bpre, wupd, bupd,
    )

    if Np == N and Hp == H:
        return out_p                                             # lane-dense, no copy
    # Strip padding (only when H/N were not already 128-aligned).
    return jnp.concatenate([out_p[:N, :H], out_p[:N, Hp:Hp + H]], axis=1)


# ---------------------------------------------------------------------------
# Pure-JAX f32 reference (segment gather/scatter) for a tolerance check.
# ---------------------------------------------------------------------------
def giph_reference(x, edge_feat, src, dst, params, k):
    N = x.shape[0]
    f32 = jnp.float32
    st = (
        jnp.maximum(x @ params["nt_w1"] + params["nt_b1"], 0.0)
        @ params["nt_w2"] + params["nt_b2"]
    )

    def agg(y, s_idx, d_idx, p):
        cat = jnp.concatenate([y[s_idx], edge_feat], axis=1)
        wpre = jnp.concatenate([p["wpre_a"], p["wpre_b"]], axis=0)
        msg = jnp.maximum(cat @ wpre + p["bpre"], 0.0)
        summ = jnp.zeros((N, msg.shape[1]), f32).at[d_idx].add(msg)
        deg = jnp.zeros((N,), f32).at[d_idx].add(1.0)
        z = jnp.where(deg[:, None] > 0, summ / jnp.maximum(deg, 1.0)[:, None], 0.0)
        return jnp.maximum(z @ p["wupd"] + p["bupd"], 0.0)

    def mp(s_idx, d_idx, sink, p):
        y = st
        for _ in range(k):
            h = agg(y, s_idx, d_idx, p).at[sink].set(0.0)
            y = st + h
        return y

    of = mp(src, dst, N - 1, params["fpa"])
    ob = mp(dst, src, 0, params["bpa"])
    return jnp.concatenate([of, ob], axis=1)


# ---------------------------------------------------------------------------
# Deterministic parameter construction (PyTorch-Linear-style uniform init)
# ---------------------------------------------------------------------------
def _linear_params(key, fan_in, fan_out):
    kw, kb = jax.random.split(key)
    bound = 1.0 / jnp.sqrt(jnp.float32(fan_in))
    w = jax.random.uniform(kw, (fan_in, fan_out), jnp.float32, -bound, bound)
    b = jax.random.uniform(kb, (1, fan_out), jnp.float32, -bound, bound)
    return w, b


def make_params(key, node_dim, edge_dim, out_dim):
    H = out_dim // 2
    keys = jax.random.split(key, 8)

    nt_w1, nt_b1 = _linear_params(keys[0], node_dim, node_dim)
    nt_w2, nt_b2 = _linear_params(keys[1], node_dim, H)

    def agg_params(k0, k1):
        wpre, bpre = _linear_params(k0, H + edge_dim, H + edge_dim)
        wupd, bupd = _linear_params(k1, H + edge_dim, H)
        return {
            "wpre_a": wpre[:H, :],      # multiplies src node state
            "wpre_b": wpre[H:, :],      # multiplies edge features
            "bpre": bpre,
            "wupd": wupd,
            "bupd": bupd,
        }

    return {
        "nt_w1": nt_w1, "nt_b1": nt_b1, "nt_w2": nt_w2, "nt_b2": nt_b2,
        "fpa": agg_params(keys[2], keys[3]),
        "bpa": agg_params(keys[4], keys[5]),
    }


# ---------------------------------------------------------------------------
if __name__ == "__main__":
    node_dim, edge_dim, out_dim, k = 6, 4, 16, 2
    N = 8  # nodes in a small DAG (node 0 = source, node N-1 = sink)

    # Small DAG edge list (src -> dst).
    src = jnp.array([0, 0, 1, 2, 3, 2, 4, 5, 6, 1, 3, 5], dtype=jnp.int32)
    dst = jnp.array([1, 2, 3, 3, 4, 5, 6, 6, 7, 7, 7, 7], dtype=jnp.int32)
    E = src.shape[0]

    key = jax.random.PRNGKey(0)
    kx, ke, kp = jax.random.split(key, 3)
    x = jax.random.normal(kx, (N, node_dim), jnp.float32)
    edge_feat = jax.random.normal(ke, (E, edge_dim), jnp.float32)
    params = make_params(kp, node_dim, edge_dim, out_dim)

    fwd = jax.jit(functools.partial(giph_embedding_radial, k=k))
    out = fwd(x, edge_feat, src, dst, params)
    jax.block_until_ready(out)

    assert out.shape == (N, out_dim), out.shape
    assert jnp.all(jnp.isfinite(out))

    # Tolerance covers bf16 MXU operands (y / msg rounded to bf16 at the
    # gather/scatter dots; accumulation stays f32).
    ref = giph_reference(x, edge_feat, src, dst, params, k)
    err = float(jnp.max(jnp.abs(out - ref)))
    assert jnp.allclose(out, ref, rtol=2e-2, atol=2e-2), err

    print("KERNEL_OK")
</pallas_src>

<mosaic_0001>
module attributes {stable_mosaic.version = 11 : i64} {
  func.func @giph_fused_kernel(%arg0: i32, %arg1: i32, %arg2: i32, %arg3: memref<128x6xf32, #tpu.memory_space<vmem>>, %arg4: memref<16x4xf32, #tpu.memory_space<vmem>>, %arg5: memref<6x6xf32, #tpu.memory_space<vmem>>, %arg6: memref<1x6xf32, #tpu.memory_space<vmem>>, %arg7: memref<6x128xf32, #tpu.memory_space<vmem>>, %arg8: memref<1x128xf32, #tpu.memory_space<vmem>>, %arg9: memref<1x16x128xbf16, #tpu.memory_space<vmem>>, %arg10: memref<1x16x128xbf16, #tpu.memory_space<vmem>>, %arg11: memref<1x128x1xf32, #tpu.memory_space<vmem>>, %arg12: memref<1x128x1xf32, #tpu.memory_space<vmem>>, %arg13: memref<1x128x128xf32, #tpu.memory_space<vmem>>, %arg14: memref<1x4x128xf32, #tpu.memory_space<vmem>>, %arg15: memref<1x1x128xf32, #tpu.memory_space<vmem>>, %arg16: memref<1x128x128xf32, #tpu.memory_space<vmem>>, %arg17: memref<1x1x128xf32, #tpu.memory_space<vmem>>, %arg18: memref<128x128xf32, #tpu.memory_space<vmem>>, %arg19: memref<128x128xf32, #tpu.memory_space<vmem>>, %arg20: memref<128x128xf32, #tpu.memory_space<vmem>>, %arg21: memref<128x128xf32, #tpu.memory_space<vmem>>) attributes {dimension_semantics = [#tpu.dimension_semantics<parallel>, #tpu.dimension_semantics<arbitrary>, #tpu.dimension_semantics<arbitrary>], iteration_bounds = array<i64: 2, 2, 1>, scalar_prefetch = 0 : i64, scratch_operands = 3 : i64, tpu.core_type = #tpu.core_type<tc>, window_params = [{pipeline_mode = #tpu.pipeline_mode<synchronous>, transform_indices = @transform_0, window_bounds = array<i64: 128, 6>}, {transform_indices = @transform_1, window_bounds = array<i64: 16, 4>}, {pipeline_mode = #tpu.pipeline_mode<synchronous>, transform_indices = @transform_2, window_bounds = array<i64: 6, 6>}, {pipeline_mode = #tpu.pipeline_mode<synchronous>, transform_indices = @transform_3, window_bounds = array<i64: 1, 6>}, {pipeline_mode = #tpu.pipeline_mode<synchronous>, transform_indices = @transform_4, window_bounds = array<i64: 6, 128>}, {pipeline_mode = #tpu.pipeline_mode<synchronous>, transform_indices = @transform_5, window_bounds = array<i64: 1, 128>}, {transform_indices = @transform_6, window_bounds = array<i64: 1, 16, 128>}, {transform_indices = @transform_7, window_bounds = array<i64: 1, 16, 128>}, {transform_indices = @transform_8, window_bounds = array<i64: 1, 128, 1>}, {transform_indices = @transform_9, window_bounds = array<i64: 1, 128, 1>}, {transform_indices = @transform_10, window_bounds = array<i64: 1, 128, 128>}, {transform_indices = @transform_11, window_bounds = array<i64: 1, 4, 128>}, {transform_indices = @transform_12, window_bounds = array<i64: 1, 1, 128>}, {transform_indices = @transform_13, window_bounds = array<i64: 1, 128, 128>}, {transform_indices = @transform_14, window_bounds = array<i64: 1, 1, 128>}, {transform_indices = @transform_15, window_bounds = array<i64: 128, 128>}]} {
    %c0_i32 = arith.constant 0 : i32
    %0 = arith.cmpi eq, %arg1, %c0_i32 : i32
    %c0_i32_0 = arith.constant 0 : i32
    %1 = arith.cmpi eq, %arg2, %c0_i32_0 : i32
    %2 = arith.andi %0, %1 : i1
    %3 = arith.extui %2 : i1 to i32
    %c0_i32_1 = arith.constant 0 : i32
    %4 = arith.cmpi ne, %3, %c0_i32_1 : i32
    scf.if %4 {
      %c0_32 = arith.constant 0 : index
      %c0_33 = arith.constant 0 : index
      %37 = vector.load %arg3[%c0_32, %c0_33] : memref<128x6xf32, #tpu.memory_space<vmem>>, vector<128x6xf32>
      %c0_34 = arith.constant 0 : index
      %c0_35 = arith.constant 0 : index
      %38 = vector.load %arg5[%c0_34, %c0_35] : memref<6x6xf32, #tpu.memory_space<vmem>>, vector<6x6xf32>
      %cst_36 = arith.constant dense<0.000000e+00> : vector<128x6xf32>
      %39 = tpu.matmul %37, %38, %cst_36 {dimension_numbers = #tpu.dot_dimension_numbers<[1], [0], [0], [1], [0, 0, 1, 1], [], []>} : vector<128x6xf32>, vector<6x6xf32>, vector<128x6xf32> -> vector<128x6xf32>
      %c0_37 = arith.constant 0 : index
      %c0_38 = arith.constant 0 : index
      %40 = vector.load %arg6[%c0_37, %c0_38] : memref<1x6xf32, #tpu.memory_space<vmem>>, vector<1x6xf32>
      %41 = vector.broadcast %40 : vector<1x6xf32> to vector<128x6xf32>
      %42 = arith.addf %39, %41 : vector<128x6xf32>
      %cst_39 = arith.constant 0.000000e+00 : f32
      %43 = vector.broadcast %cst_39 : f32 to vector<128x6xf32>
      %44 = arith.maximumf %42, %43 : vector<128x6xf32>
      %c0_40 = arith.constant 0 : index
      %c0_41 = arith.constant 0 : index
      %45 = vector.load %arg7[%c0_40, %c0_41] : memref<6x128xf32, #tpu.memory_space<vmem>>, vector<6x128xf32>
      %cst_42 = arith.constant dense<0.000000e+00> : vector<128x128xf32>
      %46 = tpu.matmul %44, %45, %cst_42 {dimension_numbers = #tpu.dot_dimension_numbers<[1], [0], [0], [1], [0, 0, 1, 1], [], []>} : vector<128x6xf32>, vector<6x128xf32>, vector<128x128xf32> -> vector<128x128xf32>
      %c0_43 = arith.constant 0 : index
      %c0_44 = arith.constant 0 : index
      %47 = vector.load %arg8[%c0_43, %c0_44] : memref<1x128xf32, #tpu.memory_space<vmem>>, vector<1x128xf32>
      %48 = vector.broadcast %47 : vector<1x128xf32> to vector<128x128xf32>
      %49 = arith.addf %46, %48 : vector<128x128xf32>
      %c0_45 = arith.constant 0 : index
      %c0_46 = arith.constant 0 : index
      %50 = vector.load %arg19[%c0_45, %c0_46] : memref<128x128xf32, #tpu.memory_space<vmem>>, vector<128x128xf32>
      tpu.vector_store %arg19[%c0_45, %c0_46], %49 {strides = array<i32>} : memref<128x128xf32, #tpu.memory_space<vmem>>, vector<128x128xf32>,
      %c0_47 = arith.constant 0 : index
      %c0_48 = arith.constant 0 : index
      %51 = vector.load %arg20[%c0_47, %c0_48] : memref<128x128xf32, #tpu.memory_space<vmem>>, vector<128x128xf32>
      tpu.vector_store %arg20[%c0_47, %c0_48], %49 {strides = array<i32>} : memref<128x128xf32, #tpu.memory_space<vmem>>, vector<128x128xf32>,
    } else {
    }
    %c0_i32_2 = arith.constant 0 : i32
    %5 = arith.cmpi eq, %arg2, %c0_i32_2 : i32
    %6 = arith.extui %5 : i1 to i32
    %c0_i32_3 = arith.constant 0 : i32
    %7 = arith.cmpi ne, %6, %c0_i32_3 : i32
    scf.if %7 {
      %cst_32 = arith.constant 0.000000e+00 : f32
      %37 = vector.broadcast %cst_32 : f32 to vector<128x128xf32>
      %c0_33 = arith.constant 0 : index
      %c0_34 = arith.constant 0 : index
      %38 = vector.load %arg21[%c0_33, %c0_34] : memref<128x128xf32, #tpu.memory_space<vmem>>, vector<128x128xf32>
      tpu.vector_store %arg21[%c0_33, %c0_34], %37 {strides = array<i32>} : memref<128x128xf32, #tpu.memory_space<vmem>>, vector<128x128xf32>,
    } else {
    }
    %c0 = arith.constant 0 : index
    %c0_4 = arith.constant 0 : index
    %c0_5 = arith.constant 0 : index
    %8 = vector.load %arg9[%c0, %c0_4, %c0_5] : memref<1x16x128xbf16, #tpu.memory_space<vmem>>, vector<1x16x128xbf16>
    %9 = vector.shape_cast %8 : vector<1x16x128xbf16> to vector<16x128xbf16>
    %c0_6 = arith.constant 0 : index
    %c0_7 = arith.constant 0 : index
    %c0_8 = arith.constant 0 : index
    %10 = vector.load %arg10[%c0_6, %c0_7, %c0_8] : memref<1x16x128xbf16, #tpu.memory_space<vmem>>, vector<1x16x128xbf16>
    %11 = vector.shape_cast %10 : vector<1x16x128xbf16> to vector<16x128xbf16>
    %c0_9 = arith.constant 0 : index
    %c0_10 = arith.constant 0 : index
    %12 = vector.load %arg20[%c0_9, %c0_10] : memref<128x128xf32, #tpu.memory_space<vmem>>, vector<128x128xf32>
    %13 = arith.truncf %12 : vector<128x128xf32> to vector<128x128xbf16>
    %cst = arith.constant dense<0.000000e+00> : vector<16x128xf32>
    %14 = tpu.matmul %9, %13, %cst {dimension_numbers = #tpu.dot_dimension_numbers<[1], [0], [0], [1], [0, 0, 1, 1], [], []>} : vector<16x128xbf16>, vector<128x128xbf16>, vector<16x128xf32> -> vector<16x128xf32>
    %c0_11 = arith.constant 0 : index
    %c0_12 = arith.constant 0 : index
    %15 = vector.load %arg4[%c0_11, %c0_12] : memref<16x4xf32, #tpu.memory_space<vmem>>, vector<16x4xf32>
    %c0_13 = arith.constant 0 : index
    %c0_14 = arith.constant 0 : index
    %c0_15 = arith.constant 0 : index
    %16 = vector.load %arg14[%c0_13, %c0_14, %c0_15] : memref<1x4x128xf32, #tpu.memory_space<vmem>>, vector<1x4x128xf32>
    %17 = vector.shape_cast %16 : vector<1x4x128xf32> to vector<4x128xf32>
    %cst_16 = arith.constant dense<0.000000e+00> : vector<16x128xf32>
    %18 = tpu.matmul %15, %17, %cst_16 {dimension_numbers = #tpu.dot_dimension_numbers<[1], [0], [0], [1], [0, 0, 1, 1], [], []>} : vector<16x4xf32>, vector<4x128xf32>, vector<16x128xf32> -> vector<16x128xf32>
    %c0_17 = arith.constant 0 : index
    %c0_18 = arith.constant 0 : index
    %c0_19 = arith.constant 0 : index
    %19 = vector.load %arg15[%c0_17, %c0_18, %c0_19] : memref<1x1x128xf32, #tpu.memory_space<vmem>>, vector<1x1x128xf32>
    %20 = vector.shape_cast %19 : vector<1x1x128xf32> to vector<1x128xf32>
    %21 = vector.broadcast %20 : vector<1x128xf32> to vector<16x128xf32>
    %22 = arith.addf %18, %21 : vector<16x128xf32>
    %c0_20 = arith.constant 0 : index
    %c0_21 = arith.constant 0 : index
    %c0_22 = arith.constant 0 : index
    %23 = vector.load %arg13[%c0_20, %c0_21, %c0_22] : memref<1x128x128xf32, #tpu.memory_space<vmem>>, vector<1x128x128xf32>
    %24 = vector.shape_cast %23 : vector<1x128x128xf32> to vector<128x128xf32>
    %cst_23 = arith.constant dense<0.000000e+00> : vector<16x128xf32>
    %25 = tpu.matmul %14, %24, %cst_23 {dimension_numbers = #tpu.dot_dimension_numbers<[1], [0], [0], [1], [0, 0, 1, 1], [], []>} : vector<16x128xf32>, vector<128x128xf32>, vector<16x128xf32> -> vector<16x128xf32>
    %26 = arith.addf %25, %22 : vector<16x128xf32>
    %cst_24 = arith.constant 0.000000e+00 : f32
    %27 = vector.broadcast %cst_24 : f32 to vector<16x128xf32>
    %28 = arith.maximumf %26, %27 : vector<16x128xf32>
    %c0_25 = arith.constant 0 : index
    %c0_26 = arith.constant 0 : index
    %29 = vector.load %arg21[%c0_25, %c0_26] : memref<128x128xf32, #tpu.memory_space<vmem>>, vector<128x128xf32>
    %30 = arith.truncf %28 : vector<16x128xf32> to vector<16x128xbf16>
    %cst_27 = arith.constant dense<0.000000e+00> : vector<128x128xf32>
    %31 = tpu.matmul %11, %30, %cst_27 {dimension_numbers = #tpu.dot_dimension_numbers<[0], [0], [1], [1], [0, 1, 1, 1], [], []>} : vector<16x128xbf16>, vector<16x128xbf16>, vector<128x128xf32> -> vector<128x128xf32>
    %32 = arith.addf %29, %31 : vector<128x128xf32>
    %c0_28 = arith.constant 0 : index
    %c0_29 = arith.constant 0 : index
    %33 = vector.load %arg21[%c0_28, %c0_29] : memref<128x128xf32, #tpu.memory_space<vmem>>, vector<128x128xf32>
    tpu.vector_store %arg21[%c0_28, %c0_29], %32 {strides = array<i32>} : memref<128x128xf32, #tpu.memory_space<vmem>>, vector<128x128xf32>,
    %c0_i32_30 = arith.constant 0 : i32
    %34 = arith.cmpi eq, %arg2, %c0_i32_30 : i32
    %35 = arith.extui %34 : i1 to i32
    %c0_i32_31 = arith.constant 0 : i32
    %36 = arith.cmpi ne, %35, %c0_i32_31 : i32
    scf.if %36 {
      %c0_32 = arith.constant 0 : index
      %c0_33 = arith.constant 0 : index
      %37 = vector.load %arg21[%c0_32, %c0_33] : memref<128x128xf32, #tpu.memory_space<vmem>>, vector<128x128xf32>
      %c0_34 = arith.constant 0 : index
      %c0_35 = arith.constant 0 : index
      %c0_36 = arith.constant 0 : index
      %38 = vector.load %arg11[%c0_34, %c0_35, %c0_36] : memref<1x128x1xf32, #tpu.memory_space<vmem>>, vector<1x128x1xf32>
      %39 = vector.shape_cast %38 : vector<1x128x1xf32> to vector<128x1xf32>
      %40 = vector.broadcast %39 : vector<128x1xf32> to vector<128x128xf32>
      %41 = arith.mulf %37, %40 : vector<128x128xf32>
      %c0_37 = arith.constant 0 : index
      %c0_38 = arith.constant 0 : index
      %c0_39 = arith.constant 0 : index
      %42 = vector.load %arg16[%c0_37, %c0_38, %c0_39] : memref<1x128x128xf32, #tpu.memory_space<vmem>>, vector<1x128x128xf32>
      %43 = vector.shape_cast %42 : vector<1x128x128xf32> to vector<128x128xf32>
      %cst_40 = arith.constant dense<0.000000e+00> : vector<128x128xf32>
      %44 = tpu.matmul %41, %43, %cst_40 {dimension_numbers = #tpu.dot_dimension_numbers<[1], [0], [0], [1], [0, 0, 1, 1], [], []>} : vector<128x128xf32>, vector<128x128xf32>, vector<128x128xf32> -> vector<128x128xf32>
      %c0_41 = arith.constant 0 : index
      %c0_42 = arith.constant 0 : index
      %c0_43 = arith.constant 0 : index
      %45 = vector.load %arg17[%c0_41, %c0_42, %c0_43] : memref<1x1x128xf32, #tpu.memory_space<vmem>>, vector<1x1x128xf32>
      %46 = vector.shape_cast %45 : vector<1x1x128xf32> to vector<1x128xf32>
      %47 = vector.broadcast %46 : vector<1x128xf32> to vector<128x128xf32>
      %48 = arith.addf %44, %47 : vector<128x128xf32>
      %cst_44 = arith.constant 0.000000e+00 : f32
      %49 = vector.broadcast %cst_44 : f32 to vector<128x128xf32>
      %50 = arith.maximumf %48, %49 : vector<128x128xf32>
      %c0_45 = arith.constant 0 : index
      %c0_46 = arith.constant 0 : index
      %51 = vector.load %arg19[%c0_45, %c0_46] : memref<128x128xf32, #tpu.memory_space<vmem>>, vector<128x128xf32>
      %c0_47 = arith.constant 0 : index
      %c0_48 = arith.constant 0 : index
      %c0_49 = arith.constant 0 : index
      %52 = vector.load %arg12[%c0_47, %c0_48, %c0_49] : memref<1x128x1xf32, #tpu.memory_space<vmem>>, vector<1x128x1xf32>
      %53 = vector.shape_cast %52 : vector<1x128x1xf32> to vector<128x1xf32>
      %54 = vector.broadcast %53 : vector<128x1xf32> to vector<128x128xf32>
      %55 = arith.mulf %54, %50 : vector<128x128xf32>
      %56 = arith.addf %51, %55 : vector<128x128xf32>
      %c0_50 = arith.constant 0 : index
      %c0_51 = arith.constant 0 : index
      %57 = vector.load %arg20[%c0_50, %c0_51] : memref<128x128xf32, #tpu.memory_space<vmem>>, vector<128x128xf32>
      tpu.vector_store %arg20[%c0_50, %c0_51], %56 {strides = array<i32>} : memref<128x128xf32, #tpu.memory_space<vmem>>, vector<128x128xf32>,
      %c0_52 = arith.constant 0 : index
      %c0_53 = arith.constant 0 : index
      %58 = vector.load %arg18[%c0_52, %c0_53] : memref<128x128xf32, #tpu.memory_space<vmem>>, vector<128x128xf32>
      tpu.vector_store %arg18[%c0_52, %c0_53], %56 {strides = array<i32>} : memref<128x128xf32, #tpu.memory_space<vmem>>, vector<128x128xf32>,
    } else {
    }
    return
  }
  func.func @transform_0(%arg0: i32, %arg1: i32, %arg2: i32) -> (i32, i32) {
    %c0_i32 = arith.constant 0 : i32
    %c0_i32_0 = arith.constant 0 : i32
    %c0_i32_1 = arith.constant 0 : i32
    return %c0_i32, %c0_i32_0 : i32, i32
  }
  func.func @transform_1(%arg0: i32, %arg1: i32, %arg2: i32) -> (i32, i32) {
    %c0_i32 = arith.constant 0 : i32
    %c0_i32_0 = arith.constant 0 : i32
    return %arg2, %c0_i32 : i32, i32
  }
  func.func @transform_2(%arg0: i32, %arg1: i32, %arg2: i32) -> (i32, i32) {
    %c0_i32 = arith.constant 0 : i32
    %c0_i32_0 = arith.constant 0 : i32
    %c0_i32_1 = arith.constant 0 : i32
    return %c0_i32, %c0_i32_0 : i32, i32
  }
  func.func @transform_3(%arg0: i32, %arg1: i32, %arg2: i32) -> (i32, i32) {
    %c0_i32 = arith.constant 0 : i32
    %c0_i32_0 = arith.constant 0 : i32
    %c0_i32_1 = arith.constant 0 : i32
    return %c0_i32, %c0_i32_0 : i32, i32
  }
  func.func @transform_4(%arg0: i32, %arg1: i32, %arg2: i32) -> (i32, i32) {
    %c0_i32 = arith.constant 0 : i32
    %c0_i32_0 = arith.constant 0 : i32
    %c0_i32_1 = arith.constant 0 : i32
    return %c0_i32, %c0_i32_0 : i32, i32
  }
  func.func @transform_5(%arg0: i32, %arg1: i32, %arg2: i32) -> (i32, i32) {
    %c0_i32 = arith.constant 0 : i32
    %c0_i32_0 = arith.constant 0 : i32
    %c0_i32_1 = arith.constant 0 : i32
    return %c0_i32, %c0_i32_0 : i32, i32
  }
  func.func @transform_6(%arg0: i32, %arg1: i32, %arg2: i32) -> (i32, i32, i32) {
    %c0_i32 = arith.constant 0 : i32
    %c0_i32_0 = arith.constant 0 : i32
    return %arg0, %arg2, %c0_i32 : i32, i32, i32
  }
  func.func @transform_7(%arg0: i32, %arg1: i32, %arg2: i32) -> (i32, i32, i32) {
    %c0_i32 = arith.constant 0 : i32
    %c0_i32_0 = arith.constant 0 : i32
    return %arg0, %arg2, %c0_i32 : i32, i32, i32
  }
  func.func @transform_8(%arg0: i32, %arg1: i32, %arg2: i32) -> (i32, i32, i32) {
    %c0_i32 = arith.constant 0 : i32
    %c0_i32_0 = arith.constant 0 : i32
    %c0_i32_1 = arith.constant 0 : i32
    return %arg0, %c0_i32, %c0_i32_0 : i32, i32, i32
  }
  func.func @transform_9(%arg0: i32, %arg1: i32, %arg2: i32) -> (i32, i32, i32) {
    %c0_i32 = arith.constant 0 : i32
    %c0_i32_0 = arith.constant 0 : i32
    %c0_i32_1 = arith.constant 0 : i32
    return %arg0, %c0_i32, %c0_i32_0 : i32, i32, i32
  }
  func.func @transform_10(%arg0: i32, %arg1: i32, %arg2: i32) -> (i32, i32, i32) {
    %c0_i32 = arith.constant 0 : i32
    %c0_i32_0 = arith.constant 0 : i32
    %c0_i32_1 = arith.constant 0 : i32
    return %arg0, %c0_i32, %c0_i32_0 : i32, i32, i32
  }
  func.func @transform_11(%arg0: i32, %arg1: i32, %arg2: i32) -> (i32, i32, i32) {
    %c0_i32 = arith.constant 0 : i32
    %c0_i32_0 = arith.constant 0 : i32
    %c0_i32_1 = arith.constant 0 : i32
    return %arg0, %c0_i32, %c0_i32_0 : i32, i32, i32
  }
  func.func @transform_12(%arg0: i32, %arg1: i32, %arg2: i32) -> (i32, i32, i32) {
    %c0_i32 = arith.constant 0 : i32
    %c0_i32_0 = arith.constant 0 : i32
    %c0_i32_1 = arith.constant 0 : i32
    return %arg0, %c0_i32, %c0_i32_0 : i32, i32, i32
  }
  func.func @transform_13(%arg0: i32, %arg1: i32, %arg2: i32) -> (i32, i32, i32) {
    %c0_i32 = arith.constant 0 : i32
    %c0_i32_0 = arith.constant 0 : i32
    %c0_i32_1 = arith.constant 0 : i32
    return %arg0, %c0_i32, %c0_i32_0 : i32, i32, i32
  }
  func.func @transform_14(%arg0: i32, %arg1: i32, %arg2: i32) -> (i32, i32, i32) {
    %c0_i32 = arith.constant 0 : i32
    %c0_i32_0 = arith.constant 0 : i32
    %c0_i32_1 = arith.constant 0 : i32
    return %arg0, %c0_i32, %c0_i32_0 : i32, i32, i32
  }
  func.func @transform_15(%arg0: i32, %arg1: i32, %arg2: i32) -> (i32, i32) {
    %c0_i32 = arith.constant 0 : i32
    %c0_i32_0 = arith.constant 0 : i32
    return %c0_i32, %arg0 : i32, i32
  }
}

</mosaic_0001>

<bundles_post_ra>
// kernel: giph_embedding_radial.1
= control target key start
LH: loop header
LB: loop body
LE: loop exit
PB: predicated region body
PF: predicated region fallthrough
CT: control target
= control target key end

     0   :  { %s3482_s0 = inlined_call_operand.vmem [shape: f32[128,6], index: 0, kind: input, shape index: {}]   ;;  %s3483_s1 = inlined_call_operand.vmem [shape: f32[16,4], index: 1, kind: input, shape index: {}]   ;;  %s3484_s2 = inlined_call_operand.vmem [shape: f32[6,6], index: 2, kind: input, shape index: {}]   ;;  %s3485_s3 = inlined_call_operand.vmem [shape: f32[1,6], index: 3, kind: input, shape index: {}]   ;;  %s3486_s4 = inlined_call_operand.vmem [shape: f32[6,128], index: 4, kind: input, shape index: {}]   ;;  %s3487_s5 = inlined_call_operand.vmem [shape: f32[1,128], index: 5, kind: input, shape index: {}]   ;;  %s3488_s6 = inlined_call_operand.vmem [shape: bf16[2,16,128], index: 6, kind: input, shape index: {}]   ;;  %s3489_s7 = inlined_call_operand.vmem [shape: bf16[2,16,128], index: 7, kind: input, shape index: {}]   ;;  %s3490_s8 = inlined_call_operand.vmem [shape: f32[2,128,1], index: 8, kind: input, shape index: {}]   ;;  %s3491_s9 = inlined_call_operand.vmem [shape: f32[2,128,1], index: 9, kind: input, shape index: {}]   ;;  %s3492_s10 = inlined_call_operand.vmem [shape: f32[2,128,128], index: 10, kind: input, shape index: {}]   ;;  %s3493_s11 = inlined_call_operand.vmem [shape: f32[2,4,128], index: 11, kind: input, shape index: {}]   ;;  %s3494_s12 = inlined_call_operand.vmem [shape: f32[2,1,128], index: 12, kind: input, shape index: {}]   ;;  %s3495_s13 = inlined_call_operand.vmem [shape: f32[2,128,128], index: 13, kind: input, shape index: {}]   ;;  %s3496_s14 = inlined_call_operand.vmem [shape: f32[2,1,128], index: 14, kind: input, shape index: {}]   ;;  %s3497_s15 = inlined_call_operand.vmem [shape: f32[128,256], index: 15, kind: output, shape index: {}]  }
   0x1   :  { %3506 = sst [smem:[#allocation15_spill]] %s3483_s1 }
   0x2   :  { %3507 = sst [smem:[#allocation16_spill]] %s3485_s3 }
   0x3   :  { %3508 = sst [smem:[#allocation17_spill]] %s3487_s5 }
   0x4   :  { %3509 = sst [smem:[#allocation18_spill]] %s3488_s6 }
   0x5   :  { %3510 = sst [smem:[#allocation19_spill]] %s3489_s7 }
   0x6   :  { %3511 = sst [smem:[#allocation20_spill]] %s3490_s8 }
   0x7   :  { %3512 = sst [smem:[#allocation21_spill]] %s3491_s9 }
   0x8   :  { %3513 = sst [smem:[#allocation22_spill]] %s3497_s15 }
   0x9   :  { %s3098_s18 = smov 0   ;;  %s3100_s19 = smov 0  }
   0xa   :  { %s3102_s20 = smov 0   ;;  %s3104_s21 = smov 0  }
   0xb   :  { %s3106_s22 = smov 0   ;;  %s3108_s23 = smov 0  }
   0xc   :  { %s3110_s24 = smov 0  }
   0xd LB: > { %3514 = sst [smem:[#allocation6_spill]] %s2993_s19  ;;  %s40_s25 = sadd.s32 1, %s3005_s22  ;;  %s3013_s24 = sphi %s3110_s24, %s25_s24   ;;  %s3009_s23 = sphi %s3108_s23, %s3541_s23   ;;  %s3005_s22 = sphi %s3106_s22, %s3540_s22   ;;  %s3001_s21 = sphi %s3104_s21, %s3539_s21   ;;  %s2997_s20 = sphi %s3102_s20, %s3538_s20   ;;  %s2993_s19 = sphi %s3100_s19, %s3537_s19   ;;  %s2989_s18 = sphi %s3098_s18, %s3536_s18  }
   0xe   : > { %3515 = sst [smem:[#allocation7_spill]] %s3001_s21  ;;  %p42_p0 = scmp.ge.s32.totalorder %s40_s25, 2 }
   0xf   : > { %3516 = sst [smem:[#allocation8_spill]] %s3005_s22  ;;  %s44_s26 = sadd.s32 1, %s3009_s23 }
  0x10   : > { %3517 = sst [smem:[#allocation9_spill]] %s3009_s23  ;;  %s2438_s27 = sadd.s32 4294967295, %s3013_s24  }
  0x11   : > { %3518 = sst [smem:[#allocation10_spill]] %s3013_s24  ;;  %p430_p1 = scmp.ne.s32.totalorder %s2993_s19, %s2989_s18 }
  0x12   : > { %s3543_s25 = smov (%p42_p0, %s40_s25), 0  ;;  %s3545_s26 = smov (!%p42_p0, %s44_s26), %s3009_s23 }
  0x13   : > { %3519 = sst [smem:[#allocation11_spill]] %s3543_s25  ;;  %p431_p2 = scmp.eq.s32.totalorder %s2438_s27, 3 }
  0x14   : > { %p2443_p3 = scmp.ge.s32.totalorder %s3013_s24, 1  ;;  %p46_p4 = scmp.ge.s32.totalorder %s3545_s26, 2 }
  0x15   : > { %p556_p5 = scmp.lt.s32.totalorder %s3013_s24, 5  ;;  %p3140_p6 = por %p431_p2, %p430_p1 }
  0x16   : > { %s3547_s26 = smov (%p46_p4, %s3545_s26), 0  ;;  %s420_s30 = sadd.s32 1, %s2993_s19 }
  0x17   : > { %s3520_s28 = scalar_select %p3140_p6, 1, 0 }
  0x18   : > { %3522 = sst [smem:[#allocation13_spill]] %s3547_s26  ;;  %p557_p7 = pnand %p2443_p3, %p556_p5 }
  0x19   : > { %3521 = sst [smem:[#allocation12_spill]] %s3520_s28  ;;  %s417_s29 = ssub.s32 %s3009_s23, %s3547_s26 }
  0x1a   : > { %p418_p8 = scmp.eq.s32.totalorder %s417_s29, 0  ;;  %560 = sbr.rel (%p557_p7) target bundleno = 1445 (0x5a5), region = 80 }
  0x1b   : > { %s648_s17 = sand.u32 (!%p557_p7), 1, %s2989_s18   ;;  %p658_p9 = scmp.lt.s32.totalorder (!%p557_p7), %s3001_s21, 1 }
  0x1c   : > { %s3150_s16 = scalar_select %p418_p8, %s2993_s19, %s420_s30  }
  0x1d   : > { %s2444_s27 = sshll.u32 (!%p557_p7), %s648_s17, 7  ;;  %p708_p10 = scmp.eq.s32.totalorder (!%p557_p7), %s2997_s20, 0 }
  0x1e   : > { %3523 = sst [smem:[#allocation14_spill]] %s3150_s16  ;;  %s3524_s6 = sld [smem:[#allocation18_spill]] (!%p557_p7) }
  0x1f   : > { %s3525_s7 = sld [smem:[#allocation19_spill]] (!%p557_p7)  ;;  %s3526_s8 = sld [smem:[#allocation20_spill]] (!%p557_p7) }
  0x20   : > { %s3527_s9 = sld [smem:[#allocation21_spill]] (!%p557_p7)  ;;  %s3203_s5 = scalar_lea.vmem (!%p557_p7), [#allocation5], %s2444_s27 }
  0x21   : > { %s3155_s25 = scalar_select %p658_p9, %s3001_s21, 1 }
  0x22   : > { %713 = sbr.rel (!%p708_p10) target bundleno = 499 (0x1f3), region = 84  ;;  %v730_v0 = vld [vmem:[%s3484_s2] sm:$0x3f] (%p708_p10)  ;;  %vm787_vm0 = vcmask (%p708_p10), 1045504   ;;  %vm738_vm1 = vcmask (%p708_p10), 48128   ;;  %v715_v2 = vld [vmem:[%s3482_s0 + $0x8] sm:$0xff] (%p708_p10) }
  0x23   : > { %s2514_s26 = sshll.u32 %s3155_s25, 3  ;;  %s2516_s23 = sshll.u32 %s3155_s25, 7  ;;  %v714_v1 = vld [vmem:[%s3482_s0] sm:$0xff] (%p708_p10)  ;;  %2626 = vmatprep.subr.msk.mxu0 (%p708_p10), %vm787_vm0, %v730_v0  ;;  %v716_v3 = vld [vmem:[%s3482_s0 + $0x10] sm:$0xff] (%p708_p10)  ;;  %v717_v4 = vld [vmem:[%s3482_s0 + $0x18] sm:$0xff] (%p708_p10) }
  0x24   : > { %s3162_s22 = scalar_lea.vmem %s3524_s6, %s2514_s26  ;;  %s3182_s29 = scalar_lea.vmem %s3492_s10, %s2516_s23  ;;  %2628 = vmatprep.mubr.msk.f32.mxu0 (%p708_p10), %vm738_vm1, %v714_v1  ;;  %2627 = vmatpush3.msk.msra.mxu0 (%p708_p10), %vm787_vm0, %v730_v0  ;;  %v718_v5 = vld [vmem:[%s3482_s0 + $0x20] sm:$0xff] (%p708_p10)  ;;  %v719_v6 = vld [vmem:[%s3482_s0 + $0x28] sm:$0xff] (%p708_p10)  ;;  %v720_v7 = vld [vmem:[%s3482_s0 + $0x30] sm:$0xff] (%p708_p10) }
  0x25   : > { %s3167_s19 = scalar_lea.vmem %s3525_s7, %s2514_s26  ;;  %s3172_s15 = scalar_lea.vmem %s3526_s8, %s2516_s23  ;;  %2629 = vmatmul.mubr.msk.f32.vlgmr.msra.gmra.mrb[0].mxu0 (%p708_p10), %vm738_vm1, %v715_v2  ;;  %v721_v8 = vld [vmem:[%s3482_s0 + $0x38] sm:$0xff] (%p708_p10)  ;;  %v722_v9 = vld [vmem:[%s3482_s0 + $0x40] sm:$0xff] (%p708_p10)  ;;  %v723_v10 = vld [vmem:[%s3482_s0 + $0x48] sm:$0xff] (%p708_p10) }
  0x26   : > { %s3177_s1 = scalar_lea.vmem %s3527_s9, %s2516_s23  ;;  %s2455_s30 = sshll.u32 %s3155_s25, 2  ;;  %2631 = vmatprep.mubr.msk.f32.mxu0 (%p708_p10), %vm738_vm1, %v716_v3  ;;  %v724_v11 = vld [vmem:[%s3482_s0 + $0x50] sm:$0xff] (%p708_p10)  ;;  %v725_v12 = vld [vmem:[%s3482_s0 + $0x58] sm:$0xff] (%p708_p10)  ;;  %v726_v13 = vld [vmem:[%s3482_s0 + $0x60] sm:$0xff] (%p708_p10) }
  0x27   : > { %s3188_s26 = scalar_lea.vmem %s3493_s11, %s2455_s30  ;;  %s698_s17 = scalar_lea.vmem %s3494_s12, %s3155_s25  ;;  %v727_v14 = vld [vmem:[%s3482_s0 + $0x68] sm:$0xff] (%p708_p10)  ;;  %v728_v15 = vld [vmem:[%s3482_s0 + $0x70] sm:$0xff] (%p708_p10)  ;;  %v729_v16 = vld [vmem:[%s3482_s0 + $0x78] sm:$0xff] (%p708_p10) }
  0x28   : > { %s3197_s21 = scalar_lea.vmem %s3495_s13, %s2516_s23  ;;  %s706_s3 = scalar_lea.vmem %s3496_s14, %s3155_s25  ;;  %v952_v17 = vld [vmem:[%s3486_s4] sm:$0x3f] (%p708_p10) }
  0x29   : > { %2632 = vmatmul.mubr.msk.f32.gmra.mrb[2].mxu0 %vm738_vm1, %v717_v4  ;;  %2652 = vmatprep.subr.msk.mxu1 %vm787_vm0, %v952_v17  ;;  %s3528_s16 = sld [smem:[#allocation16_spill]]  ;;  %s3529_s8 = sld [smem:[#allocation17_spill]] }
  0x2a   : > { %2634 = vmatprep.mubr.msk.f32.mxu0 %vm738_vm1, %v718_v5  ;;  %2653 = vmatpush3.msk.msra.mxu1 %vm787_vm0, %v952_v17 }
  0x2d   : > { %2635 = vmatmul.mubr.msk.f32.gmra.mrb[4].mxu0 %vm738_vm1, %v719_v6 }
  0x2e   : > { %2637 = vmatprep.mubr.msk.f32.mxu0 %vm738_vm1, %v720_v7 }
  0x2f   : > { %v2459_v18 = vld [vmem:[%s3528_s16] ss:$0 sm:$0xff] }
  0x30   : > { %v2477_v3 = vld [vmem:[%s3529_s8] ss:$0 sm:$0xff] }
  0x31   : > { %2638 = vmatmul.mubr.msk.f32.gmra.mrb[6].mxu0 %vm738_vm1, %v721_v8 }
  0x32   : > { %2640 = vmatprep.mubr.msk.f32.mxu0 %vm738_vm1, %v722_v9 }
  0x35   : > { %2641 = vmatmul.mubr.msk.f32.gmra.mrb[8].mxu0 %vm738_vm1, %v723_v10 }
  0x36   : > { %2643 = vmatprep.mubr.msk.f32.mxu0 %vm738_vm1, %v724_v11 }
  0x39   : > { %2644 = vmatmul.mubr.msk.f32.gmra.mrb[10].mxu0 %vm738_vm1, %v725_v12 }
  0x3a   : > { %2646 = vmatprep.mubr.msk.f32.mxu0 %vm738_vm1, %v726_v13 }
  0x3d   : > { %2647 = vmatmul.mubr.msk.f32.gmra.mrb[12].mxu0 %vm738_vm1, %v727_v14 }
  0x3e   : > { %2649 = vmatprep.mubr.msk.f32.mxu0 %vm738_vm1, %v728_v15 }
  0x41   : > { %2650 = vmatmul.mubr.msk.f32.gmra.mrb[14].mxu0 %vm738_vm1, %v729_v16 }
  0xf8   : > { %v2630_v19 = vpop.f32.mrb[0].mxu0 }
  0xf9   : > { %v863_v20 = vadd.f32 %v2630_v19, %v2459_v18  ;;  %v857_v21 = vpop.f32.mrb[1].mxu0 }
  0xfa   : > { %v858_v22 = vadd.f32 %v2459_v18, %v857_v21 }
  0xfb   : > { %v937_v25 = vmax.f32 %v863_v20, 0.0 }
  0xfc   : > { %v936_v23 = vmax.f32 %v858_v22, 0.0  ;;  %v2633_v24 = vpop.f32.mrb[2].mxu0 }
  0xfd   : > { %v873_v26 = vadd.f32 %v2633_v24, %v2459_v18  ;;  %v867_v27 = vpop.f32.mrb[3].mxu0 }
  0xfe   : > { %v868_v28 = vadd.f32 %v2459_v18, %v867_v27  ;;  %2654 = vmatprep.mubr.msk.f32.mxu1 %vm738_vm1, %v936_v23 }
  0xff   : > { %2655 = vmatmul.mubr.msk.f32.vlgmr.msra.gmra.mrb[0].mxu1 %vm738_vm1, %v937_v25  ;;  %v939_v31 = vmax.f32 %v873_v26, 0.0 }
 0x100   : > { %v938_v29 = vmax.f32 %v868_v28, 0.0  ;;  %v2636_v30 = vpop.f32.mrb[4].mxu0 }
 0x101   : > { %v883_v32 = vadd.f32 %v2636_v30, %v2459_v18  ;;  %v877_v33 = vpop.f32.mrb[5].mxu0 }
 0x102   : > { %v878_v34 = vadd.f32 %v2459_v18, %v877_v33  ;;  %2657 = vmatprep.mubr.msk.f32.mxu1 %vm738_vm1, %v938_v29 }
 0x103   : > { %2658 = vmatmul.mubr.msk.f32.gmra.mrb[2].mxu1 %vm738_vm1, %v939_v31  ;;  %v941_v37 = vmax.f32 %v883_v32, 0.0 }
 0x104   : > { %v940_v35 = vmax.f32 %v878_v34, 0.0  ;;  %v2639_v36 = vpop.f32.mrb[6].mxu0 }
 0x105   : > { %v893_v38 = vadd.f32 %v2639_v36, %v2459_v18  ;;  %v887_v39 = vpop.f32.mrb[7].mxu0 }
 0x106   : > { %v888_v40 = vadd.f32 %v2459_v18, %v887_v39  ;;  %2660 = vmatprep.mubr.msk.f32.mxu1 %vm738_vm1, %v940_v35 }
 0x107   : > { %2661 = vmatmul.mubr.msk.f32.gmra.mrb[4].mxu1 %vm738_vm1, %v941_v37  ;;  %v943_v43 = vmax.f32 %v893_v38, 0.0 }
 0x108   : > { %v942_v41 = vmax.f32 %v888_v40, 0.0  ;;  %v2642_v42 = vpop.f32.mrb[8].mxu0 }
 0x109   : > { %v903_v44 = vadd.f32 %v2642_v42, %v2459_v18  ;;  %v897_v45 = vpop.f32.mrb[9].mxu0 }
 0x10a   : > { %v898_v46 = vadd.f32 %v2459_v18, %v897_v45  ;;  %2663 = vmatprep.mubr.msk.f32.mxu1 %vm738_vm1, %v942_v41 }
 0x10b   : > { %2664 = vmatmul.mubr.msk.f32.gmra.mrb[6].mxu1 %vm738_vm1, %v943_v43  ;;  %v945_v49 = vmax.f32 %v903_v44, 0.0 }
 0x10c   : > { %v944_v47 = vmax.f32 %v898_v46, 0.0  ;;  %v2645_v48 = vpop.f32.mrb[10].mxu0 }
 0x10d   : > { %v913_v50 = vadd.f32 %v2645_v48, %v2459_v18  ;;  %v907_v51 = vpop.f32.mrb[11].mxu0 }
 0x10e   : > { %v908_v52 = vadd.f32 %v2459_v18, %v907_v51  ;;  %2666 = vmatprep.mubr.msk.f32.mxu1 %vm738_vm1, %v944_v47 }
 0x10f   : > { %2667 = vmatmul.mubr.msk.f32.gmra.mrb[8].mxu1 %vm738_vm1, %v945_v49  ;;  %v947_v55 = vmax.f32 %v913_v50, 0.0 }
 0x110   : > { %v946_v53 = vmax.f32 %v908_v52, 0.0  ;;  %v2648_v54 = vpop.f32.mrb[12].mxu0 }
 0x111   : > { %v923_v56 = vadd.f32 %v2648_v54, %v2459_v18  ;;  %v917_v57 = vpop.f32.mrb[13].mxu0 }
 0x112   : > { %v918_v58 = vadd.f32 %v2459_v18, %v917_v57  ;;  %2669 = vmatprep.mubr.msk.f32.mxu1 %vm738_vm1, %v946_v53 }
 0x113   : > { %2670 = vmatmul.mubr.msk.f32.gmra.mrb[10].mxu1 %vm738_vm1, %v947_v55  ;;  %v949_v61 = vmax.f32 %v923_v56, 0.0 }
 0x114   : > { %v948_v59 = vmax.f32 %v918_v58, 0.0  ;;  %v2651_v60 = vpop.f32.mrb[14].mxu0 }
 0x115   : > { %v933_v62 = vadd.f32 %v2651_v60, %v2459_v18  ;;  %v927_v63 = vpop.f32.mrb[15].mxu0 }
 0x116   : > { %v928_v0 = vadd.f32 %v2459_v18, %v927_v63  ;;  %2672 = vmatprep.mubr.msk.f32.mxu1 %vm738_vm1, %v948_v59 }
 0x117   : > { %2673 = vmatmul.mubr.msk.f32.gmra.mrb[12].mxu1 %vm738_vm1, %v949_v61  ;;  %v951_v2 = vmax.f32 %v933_v62, 0.0 }
 0x118   : > { %v950_v1 = vmax.f32 %v928_v0, 0.0 }
 0x11a   : > { %2675 = vmatprep.mubr.msk.f32.mxu1 %vm738_vm1, %v950_v1 }
 0x11b   : > { %2676 = vmatmul.mubr.msk.f32.gmra.mrb[14].mxu1 %vm738_vm1, %v951_v2 }
 0x1d2   : > { %v2656_v4 = vpop.f32.mrb[0].mxu1 }
 0x1d3   : > { %v1083_v5 = vadd.f32 %v2656_v4, %v2477_v3  ;;  %v1077_v6 = vpop.f32.mrb[1].mxu1 }
 0x1d4   : > { %v1078_v7 = vadd.f32 %v2477_v3, %v1077_v6 }
 0x1d5   : > { %1157 = vst [vmem:[#allocation2 + $0x8] sm:$0xff] %v1083_v5  ;;  %1173 = vst [vmem:[#allocation3 + $0x8] sm:$0xff] %v1083_v5 }
 0x1d6   : > { %1156 = vst [vmem:[#allocation2] sm:$0xff] %v1078_v7  ;;  %1172 = vst [vmem:[#allocation3] sm:$0xff] %v1078_v7  ;;  %v2659_v8 = vpop.f32.mrb[2].mxu1 }
 0x1d7   : > { %v1093_v9 = vadd.f32 %v2659_v8, %v2477_v3  ;;  %v1087_v10 = vpop.f32.mrb[3].mxu1 }
 0x1d8   : > { %v1088_v11 = vadd.f32 %v2477_v3, %v1087_v10 }
 0x1d9   : > { %1159 = vst [vmem:[#allocation2 + $0x18] sm:$0xff] %v1093_v9  ;;  %1175 = vst [vmem:[#allocation3 + $0x18] sm:$0xff] %v1093_v9 }
 0x1da   : > { %1158 = vst [vmem:[#allocation2 + $0x10] sm:$0xff] %v1088_v11  ;;  %1174 = vst [vmem:[#allocation3 + $0x10] sm:$0xff] %v1088_v11  ;;  %v2662_v12 = vpop.f32.mrb[4].mxu1 }
 0x1db   : > { %v1103_v13 = vadd.f32 %v2662_v12, %v2477_v3  ;;  %v1097_v14 = vpop.f32.mrb[5].mxu1 }
 0x1dc   : > { %v1098_v15 = vadd.f32 %v2477_v3, %v1097_v14 }
 0x1dd   : > { %1161 = vst [vmem:[#allocation2 + $0x28] sm:$0xff] %v1103_v13  ;;  %1177 = vst [vmem:[#allocation3 + $0x28] sm:$0xff] %v1103_v13 }
 0x1de   : > { %1160 = vst [vmem:[#allocation2 + $0x20] sm:$0xff] %v1098_v15  ;;  %1176 = vst [vmem:[#allocation3 + $0x20] sm:$0xff] %v1098_v15  ;;  %v2665_v16 = vpop.f32.mrb[6].mxu1 }
 0x1df   : > { %v1113_v17 = vadd.f32 %v2665_v16, %v2477_v3  ;;  %v1107_v18 = vpop.f32.mrb[7].mxu1 }
 0x1e0   : > { %v1108_v19 = vadd.f32 %v2477_v3, %v1107_v18 }
 0x1e1   : > { %1163 = vst [vmem:[#allocation2 + $0x38] sm:$0xff] %v1113_v17  ;;  %1179 = vst [vmem:[#allocation3 + $0x38] sm:$0xff] %v1113_v17 }
 0x1e2   : > { %1162 = vst [vmem:[#allocation2 + $0x30] sm:$0xff] %v1108_v19  ;;  %1178 = vst [vmem:[#allocation3 + $0x30] sm:$0xff] %v1108_v19  ;;  %v2668_v20 = vpop.f32.mrb[8].mxu1 }
 0x1e3   : > { %v1123_v21 = vadd.f32 %v2668_v20, %v2477_v3  ;;  %v1117_v22 = vpop.f32.mrb[9].mxu1 }
 0x1e4   : > { %v1118_v23 = vadd.f32 %v2477_v3, %v1117_v22 }
 0x1e5   : > { %1165 = vst [vmem:[#allocation2 + $0x48] sm:$0xff] %v1123_v21  ;;  %1181 = vst [vmem:[#allocation3 + $0x48] sm:$0xff] %v1123_v21 }
 0x1e6   : > { %1164 = vst [vmem:[#allocation2 + $0x40] sm:$0xff] %v1118_v23  ;;  %1180 = vst [vmem:[#allocation3 + $0x40] sm:$0xff] %v1118_v23  ;;  %v2671_v24 = vpop.f32.mrb[10].mxu1 }
 0x1e7   : > { %v1133_v25 = vadd.f32 %v2671_v24, %v2477_v3  ;;  %v1127_v26 = vpop.f32.mrb[11].mxu1 }
 0x1e8   : > { %v1128_v27 = vadd.f32 %v2477_v3, %v1127_v26 }
 0x1e9   : > { %1167 = vst [vmem:[#allocation2 + $0x58] sm:$0xff] %v1133_v25  ;;  %1183 = vst [vmem:[#allocation3 + $0x58] sm:$0xff] %v1133_v25 }
 0x1ea   : > { %1166 = vst [vmem:[#allocation2 + $0x50] sm:$0xff] %v1128_v27  ;;  %1182 = vst [vmem:[#allocation3 + $0x50] sm:$0xff] %v1128_v27  ;;  %v2674_v28 = vpop.f32.mrb[12].mxu1 }
 0x1eb   : > { %v1143_v29 = vadd.f32 %v2674_v28, %v2477_v3  ;;  %v1137_v30 = vpop.f32.mrb[13].mxu1 }
 0x1ec   : > { %v1138_v31 = vadd.f32 %v2477_v3, %v1137_v30 }
 0x1ed   : > { %1169 = vst [vmem:[#allocation2 + $0x68] sm:$0xff] %v1143_v29  ;;  %1185 = vst [vmem:[#allocation3 + $0x68] sm:$0xff] %v1143_v29 }
 0x1ee   : > { %1168 = vst [vmem:[#allocation2 + $0x60] sm:$0xff] %v1138_v31  ;;  %1184 = vst [vmem:[#allocation3 + $0x60] sm:$0xff] %v1138_v31  ;;  %v2677_v32 = vpop.f32.mrb[14].mxu1 }
 0x1ef   : > { %v1153_v33 = vadd.f32 %v2677_v32, %v2477_v3  ;;  %v1147_v34 = vpop.f32.mrb[15].mxu1 }
 0x1f0   : > { %v1148_v35 = vadd.f32 %v2477_v3, %v1147_v34 }
 0x1f1   : > { %1171 = vst [vmem:[#allocation2 + $0x78] sm:$0xff] %v1153_v33  ;;  %1187 = vst [vmem:[#allocation3 + $0x78] sm:$0xff] %v1153_v33 }
 0x1f2   : > { %1170 = vst [vmem:[#allocation2 + $0x70] sm:$0xff] %v1148_v35  ;;  %1186 = vst [vmem:[#allocation3 + $0x70] sm:$0xff] %v1148_v35 }
 0x1f3 PF: > { %v1211_v36 = vld [vmem:[#allocation3] sm:$0xff]  ;;  %v1212_v37 = vld [vmem:[#allocation3 + $0x8] sm:$0xff]  ;;  %v1213_v38 = vld [vmem:[#allocation3 + $0x10] sm:$0xff]  ;;  %v3015_v39 = vmov 0.0   ;;  %vm3016_vm2 = vmmov 0   ;;  %vm1299_vm3 = vcmask 1043456  }
 0x1f4   : > { %2678 = vmatprep.subr.bf16.mxu0 %v3015_v39  ;;  %v1227_v40 = vpack.c.bf16 %v1212_v37, %v1211_v36  ;;  %v1214_v41 = vld [vmem:[#allocation3 + $0x18] sm:$0xff]  ;;  %2694 = vmatprep.mubr.msk.bf16.mxu0 %vm3016_vm2, %v3015_v39  ;;  %v1215_v43 = vld [vmem:[#allocation3 + $0x20] sm:$0xff]  ;;  %v1216_v44 = vld [vmem:[#allocation3 + $0x28] sm:$0xff]  ;;  %s3530_s23 = sld [smem:[#allocation15_spill]]  ;;  %vm1292_vm4 = vcmask 31744   ;;  %v3017_v27 = vmov 0  }
 0x1f5   : > { %v1228_v42 = vpack.c.bf16 %v1214_v41, %v1213_v38  ;;  %v1217_v45 = vld [vmem:[#allocation3 + $0x30] sm:$0xff]  ;;  %v1284_v46 = vld [vmem:[%s3188_s26] sm:$0xf]  ;;  %v1229_v48 = vpack.c.bf16 %v1216_v44, %v1215_v43  ;;  %v1379_v50 = vld [vmem:[%s3182_s29 + $0x8] sm:$0xff]  ;;  %2956 = vset.pattern.permute.xlu1 %v3017_v27  ;;  %vm1510_vm5 = vcmask 130048  }
 0x1f6   : > { %2679 = vmatpush3.bf16.msra.mxu0 %v1227_v40  ;;  %2698 = vmatprep.subr.msk.mxu1 %vm1299_vm3, %v1284_v46  ;;  %v1378_v49 = vld [vmem:[%s3182_s29] sm:$0xff]  ;;  %v1218_v52 = vld [vmem:[#allocation3 + $0x38] sm:$0xff]  ;;  %v1380_v54 = vld [vmem:[%s3182_s29 + $0x10] sm:$0xff] }
 0x1f7   : > { %2680 = vmatprep.subr.bf16.mxu0 %v3015_v39  ;;  %2699 = vmatpush3.msk.msra.mxu1 %vm1299_vm3, %v1284_v46  ;;  %v2812_v53 = vpack.c.bf16 %v1379_v50, %v1378_v49  ;;  %v1381_v55 = vld [vmem:[%s3182_s29 + $0x18] sm:$0xff]  ;;  %v1382_v57 = vld [vmem:[%s3182_s29 + $0x20] sm:$0xff]  ;;  %v1383_v58 = vld [vmem:[%s3182_s29 + $0x28] sm:$0xff]  ;;  %v1230_v59 = vpack.c.bf16 %v1218_v52, %v1217_v45 }
 0x1f8   : > { %v2816_v56 = vpack.c.bf16 %v1381_v55, %v1380_v54  ;;  %v1219_v60 = vld [vmem:[#allocation3 + $0x40] sm:$0xff]  ;;  %v1220_v61 = vld [vmem:[#allocation3 + $0x48] sm:$0xff]  ;;  %v2820_v62 = vpack.c.bf16 %v1383_v58, %v1382_v57  ;;  %v1384_v63 = vld [vmem:[%s3182_s29 + $0x30] sm:$0xff] }
 0x1f9   : > { %2813 = vmatprep.subr.bf16.mxu1 %v2812_v53  ;;  %v1385_v0 = vld [vmem:[%s3182_s29 + $0x38] sm:$0xff]  ;;  %v1231_v1 = vpack.c.bf16 %v1220_v61, %v1219_v60  ;;  %v1221_v2 = vld [vmem:[#allocation3 + $0x50] sm:$0xff]  ;;  %v1386_v5 = vld [vmem:[%s3182_s29 + $0x40] sm:$0xff] }
 0x1fa   : > { %s3531_s27 = smov %s3530_s23  ;;  %v1282_v47 = vld [vmem:[%s3530_s23] sm:$0xff]  ;;  %2681 = vmatpush3.bf16.msra.mxu0 %v1228_v42  ;;  %v1222_v3 = vld [vmem:[#allocation3 + $0x58] sm:$0xff]  ;;  %v2824_v4 = vpack.c.bf16 %v1385_v0, %v1384_v63  ;;  %v1387_v6 = vld [vmem:[%s3182_s29 + $0x48] sm:$0xff] }
 0x1fb   : > { %v1283_v51 = vld [vmem:[%s3531_s27 + $0x8] sm:$0xff]  ;;  %2682 = vmatprep.subr.bf16.mxu0 %v3015_v39  ;;  %2700 = vmatprep.mubr.msk.f32.mxu1 %vm1292_vm4, %v1282_v47  ;;  %v1232_v7 = vpack.c.bf16 %v1222_v3, %v1221_v2  ;;  %v1223_v8 = vld [vmem:[#allocation3 + $0x60] sm:$0xff]  ;;  %v2828_v10 = vpack.c.bf16 %v1387_v6, %v1386_v5  ;;  %v1388_v11 = vld [vmem:[%s3182_s29 + $0x50] sm:$0xff] }
 0x1fc   : > { %2701 = vmatmul.mubr.msk.f32.vlgmr.msra.gmra.mrb[0].mxu1 %vm1292_vm4, %v1283_v51  ;;  %v1224_v9 = vld [vmem:[#allocation3 + $0x68] sm:$0xff]  ;;  %v1389_v12 = vld [vmem:[%s3182_s29 + $0x58] sm:$0xff]  ;;  %v1225_v14 = vld [vmem:[#allocation3 + $0x70] sm:$0xff] }
 0x1fd   : > { %2815 = vmatpush3.bf16.msra.mxu1 %v2812_v53  ;;  %v1233_v13 = vpack.c.bf16 %v1224_v9, %v1223_v8  ;;  %v1226_v15 = vld [vmem:[#allocation3 + $0x78] sm:$0xff]  ;;  %v2832_v16 = vpack.c.bf16 %v1389_v12, %v1388_v11  ;;  %v1390_v17 = vld [vmem:[%s3182_s29 + $0x60] sm:$0xff]  ;;  %v1391_v18 = vld [vmem:[%s3182_s29 + $0x68] sm:$0xff] }
 0x1fe   : > { %2683 = vmatpush3.bf16.msra.mxu0 %v1229_v48  ;;  %2817 = vmatprep.subr.bf16.mxu1 %v2816_v56  ;;  %v1234_v19 = vpack.c.bf16 %v1226_v15, %v1225_v14  ;;  %v2836_v20 = vpack.c.bf16 %v1391_v18, %v1390_v17  ;;  %v1392_v21 = vld [vmem:[%s3182_s29 + $0x70] sm:$0xff]  ;;  %v1393_v22 = vld [vmem:[%s3182_s29 + $0x78] sm:$0xff]  ;;  %v2957_v23 = vld [vmem:[%s3162_s22] sm:$0xff]   ;;  %s3533_s29 = sld [smem:[#allocation7_spill]] (%p3140_p6) }
 0x1ff   : > { %2684 = vmatprep.subr.bf16.mxu0 %v3015_v39  ;;  %v2840_v24 = vpack.c.bf16 %v1393_v22, %v1392_v21  ;;  %v2958_v25 = vld [vmem:[%s3167_s19] sm:$0xff]   ;;  %v1684_v26 = vld [vmem:[%s3172_s15 + $0x8] sm:$0xff]  ;;  %v1685_v32 = vld [vmem:[%s3172_s15 + $0x10] sm:$0xff] }
 0x200   : > { %1494 = vxpose.xlu0.c.b16.start.end [1/1] (short) %v2958_v25, 128  ;;  %1706 = vperm.xlu1 %2956, %v1684_v26   ;;  %v1686_v34 = vld [vmem:[%s3172_s15 + $0x18] sm:$0xff]  ;;  %v1687_v35 = vld [vmem:[%s3172_s15 + $0x20] sm:$0xff]  ;;  %v1693_v36 = vld [vmem:[%s3172_s15 + $0x50] sm:$0xff] }
 0x201   : > { %2819 = vmatpush3.bf16.msra.mxu1 %v2816_v56  ;;  %v1688_v37 = vld [vmem:[%s3172_s15 + $0x28] sm:$0xff]  ;;  %v1694_v38 = vld [vmem:[%s3172_s15 + $0x58] sm:$0xff]  ;;  %v1695_v40 = vld [vmem:[%s3172_s15 + $0x60] sm:$0xff] }
 0x202   : > { %2685 = vmatpush3.bf16.msra.mxu0 %v1230_v59  ;;  %2821 = vmatprep.subr.bf16.mxu1 %v2820_v62  ;;  %v1690_v41 = vld [vmem:[%s3172_s15 + $0x38] sm:$0xff]  ;;  %v1696_v42 = vld [vmem:[%s3172_s15 + $0x68] sm:$0xff]  ;;  %v1683_v43 = vld [vmem:[%s3172_s15] sm:$0xff] }
 0x203   : > { %2686 = vmatprep.subr.bf16.mxu0 %v3015_v39  ;;  %v1697_v44 = vld [vmem:[%s3172_s15 + $0x70] sm:$0xff]  ;;  %v1691_v45 = vld [vmem:[%s3172_s15 + $0x40] sm:$0xff]  ;;  %v1698_v46 = vld [vmem:[%s3172_s15 + $0x78] sm:$0xff] }
 0x204   : > { %1711 = vperm.xlu1 %2956, %v1685_v32   ;;  %v1692_v47 = vld [vmem:[%s3172_s15 + $0x48] sm:$0xff]  ;;  %v1995_v49 = vld [vmem:[%s3177_s1] sm:$0xff]  ;;  %v1998_v50 = vld [vmem:[%s3177_s1 + $0x18] sm:$0xff]  ;;  %s2511_s26 = sshll.u32 (%p3140_p6), %s3533_s29, 3 }
 0x205   : > { %2823 = vmatpush3.bf16.msra.mxu1 %v2820_v62  ;;  %v1996_v48 = vld [vmem:[%s3177_s1 + $0x8] sm:$0xff]  ;;  %v1997_v51 = vld [vmem:[%s3177_s1 + $0x10] sm:$0xff]  ;;  %v1999_v53 = vld [vmem:[%s3177_s1 + $0x20] sm:$0xff] }
 0x206   : > { %2687 = vmatpush3.bf16.msra.mxu0 %v1231_v1  ;;  %2825 = vmatprep.subr.bf16.mxu1 %v2824_v4  ;;  %v2000_v52 = vld [vmem:[%s3177_s1 + $0x28] sm:$0xff]  ;;  %v2002_v54 = vld [vmem:[%s3177_s1 + $0x38] sm:$0xff]  ;;  %v2001_v55 = vld [vmem:[%s3177_s1 + $0x30] sm:$0xff] }
 0x207   : > { %2688 = vmatprep.subr.bf16.mxu0 %v3015_v39  ;;  %v2004_v56 = vld [vmem:[%s3177_s1 + $0x48] sm:$0xff]  ;;  %v2003_v57 = vld [vmem:[%s3177_s1 + $0x40] sm:$0xff]  ;;  %v2006_v61 = vld [vmem:[%s3177_s1 + $0x58] sm:$0xff] }
 0x208   : > { %1716 = vperm.xlu1 %2956, %v1686_v34   ;;  %v1795_v58 = vld [vmem:[%s3197_s21] sm:$0xff]  ;;  %v1796_v59 = vld [vmem:[%s3197_s21 + $0x8] sm:$0xff]  ;;  %v2005_v62 = vld [vmem:[%s3177_s1 + $0x50] sm:$0xff] }
 0x209   : > { %2827 = vmatpush3.bf16.msra.mxu1 %v2824_v4  ;;  %2955 = vset.pattern.permute.xlu0 %v3017_v27  ;;  %v2844_v60 = vpack.c.bf16 %v1796_v59, %v1795_v58  ;;  %v1797_v63 = vld [vmem:[%s3197_s21 + $0x10] sm:$0xff]  ;;  %v1798_v0 = vld [vmem:[%s3197_s21 + $0x18] sm:$0xff]  ;;  %v2008_v2 = vld [vmem:[%s3177_s1 + $0x68] sm:$0xff] }
 0x20a   : > { %2689 = vmatpush3.bf16.msra.mxu0 %v1232_v7  ;;  %2829 = vmatprep.subr.bf16.mxu1 %v2828_v10  ;;  %v2848_v1 = vpack.c.bf16 %v1798_v0, %v1797_v63  ;;  %v2007_v3 = vld [vmem:[%s3177_s1 + $0x60] sm:$0xff]  ;;  %v1800_v5 = vld [vmem:[%s3197_s21 + $0x28] sm:$0xff]  ;;  %v2010_v7 = vld [vmem:[%s3177_s1 + $0x78] sm:$0xff] }
 0x20b   : > { %2690 = vmatprep.subr.bf16.mxu0 %v3015_v39  ;;  %v1799_v4 = vld [vmem:[%s3197_s21 + $0x20] sm:$0xff]  ;;  %v2009_v8 = vld [vmem:[%s3177_s1 + $0x70] sm:$0xff] }
 0x20c   : > { %1721 = vperm.xlu1 %2956, %v1687_v35   ;;  %v2852_v6 = vpack.c.bf16 %v1800_v5, %v1799_v4  ;;  %v1801_v9 = vld [vmem:[%s3197_s21 + $0x30] sm:$0xff]  ;;  %v1803_v11 = vld [vmem:[%s3197_s21 + $0x40] sm:$0xff] }
 0x20d   : > { %2831 = vmatpush3.bf16.msra.mxu1 %v2828_v10  ;;  %v1802_v10 = vld [vmem:[%s3197_s21 + $0x38] sm:$0xff]  ;;  %v1805_v15 = vld [vmem:[%s3197_s21 + $0x50] sm:$0xff]  ;;  %v1807_v18 = vld [vmem:[%s3197_s21 + $0x60] sm:$0xff] }
 0x20e   : > { %2691 = vmatpush3.bf16.msra.mxu0 %v1233_v13  ;;  %2833 = vmatprep.subr.bf16.mxu1 %v2832_v16  ;;  %v2856_v12 = vpack.c.bf16 %v1802_v10, %v1801_v9  ;;  %v1804_v13 = vld [vmem:[%s3197_s21 + $0x48] sm:$0xff]  ;;  %v2496_v22 = vld [vmem:[%s698_s17] ss:$0 sm:$0xff] }
 0x20f   : > { %2692 = vmatprep.subr.bf16.mxu0 %v3015_v39  ;;  %v1689_v39 = vld [vmem:[%s3172_s15 + $0x30] sm:$0xff]  ;;  %v2860_v14 = vpack.c.bf16 %v1804_v13, %v1803_v11 }
 0x210   : > { %1751 = vperm.xlu1 %2956, %v1693_v36   ;;  %v1809_v36 = vld [vmem:[%s3197_s21 + $0x70] sm:$0xff] }
 0x211   : > { %2835 = vmatpush3.bf16.msra.mxu1 %v2832_v16  ;;  %v1806_v16 = vld [vmem:[%s3197_s21 + $0x58] sm:$0xff] }
 0x212   : > { %2693 = vmatpush3.bf16.msra.mxu0 %v1234_v19  ;;  %2837 = vmatprep.subr.bf16.mxu1 %v2836_v20  ;;  %v2864_v17 = vpack.c.bf16 %v1806_v16, %v1805_v15  ;;  %v1808_v19 = vld [vmem:[%s3197_s21 + $0x68] sm:$0xff] }
 0x213   : > { %2845 = vmatprep.subr.bf16.mxu0 %v2844_v60 }
 0x214   : > { %1726 = vperm.xlu1 %2956, %v1688_v37   ;;  %v1810_v37 = vld [vmem:[%s3197_s21 + $0x78] sm:$0xff] }
 0x215   : > { %2695 = vmatmul.mubr.bf16.vlgmr.msra.gmra.mrb[0].mxu0 %v2957_v23  ;;  %2839 = vmatpush3.bf16.msra.mxu1 %v2836_v20  ;;  %v2868_v20 = vpack.c.bf16 %v1808_v19, %v1807_v18 }
 0x216   : > { %2841 = vmatprep.subr.bf16.mxu1 %v2840_v24  ;;  %2847 = vmatpush3.bf16.msra.mxu0 %v2844_v60 }
 0x217   : > { %2849 = vmatprep.subr.bf16.mxu0 %v2848_v1 }
 0x218   : > { %1756 = vperm.xlu1 %2956, %v1694_v38   ;;  %v2872_v38 = vpack.c.bf16 %v1810_v37, %v1809_v36 }
 0x219   : > { %2843 = vmatpush3.bf16.msra.mxu1 %v2840_v24 }
 0x21a   : > { %2851 = vmatpush3.bf16.msra.mxu0 %v2848_v1 }
 0x21b   : > { %2853 = vmatprep.subr.bf16.mxu0 %v2852_v6 }
 0x21c   : > { %1731 = vperm.xlu1 %2956, %v1689_v39  }
 0x21e   : > { %2855 = vmatpush3.bf16.msra.mxu0 %v2852_v6 }
 0x21f   : > { %2857 = vmatprep.subr.bf16.mxu0 %v2856_v12 }
 0x220   : > { %1761 = vperm.xlu1 %2956, %v1695_v40  }
 0x222   : > { %2859 = vmatpush3.bf16.msra.mxu0 %v2856_v12 }
 0x223   : > { %2861 = vmatprep.subr.bf16.mxu0 %v2860_v14 }
 0x224   : > { %1736 = vperm.xlu1 %2956, %v1690_v41  }
 0x225   : > { %1701 = vperm.xlu0 %2955, %v1683_v43  }
 0x226   : > { %2863 = vmatpush3.bf16.msra.mxu0 %v2860_v14 }
 0x227   : > { %2865 = vmatprep.subr.bf16.mxu0 %v2864_v17 }
 0x228   : > { %1766 = vperm.xlu1 %2956, %v1696_v42  }
 0x229   : > { %1741 = vperm.xlu0 %2955, %v1691_v45  }
 0x22a   : > { %2867 = vmatpush3.bf16.msra.mxu0 %v2864_v17 }
 0x22b   : > { %2869 = vmatprep.subr.bf16.mxu0 %v2868_v20 }
 0x22c   : > { %1771 = vperm.xlu1 %2956, %v1697_v44  }
 0x22d   : > { %1746 = vperm.xlu0 %2955, %v1692_v47  }
 0x22e   : > { %2871 = vmatpush3.bf16.msra.mxu0 %v2868_v20 }
 0x22f   : > { %2873 = vmatprep.subr.bf16.mxu0 %v2872_v38 }
 0x230   : > { %1776 = vperm.xlu1 %2956, %v1698_v46  }
 0x231   : > { %2013 = vperm.xlu0 %2955, %v1995_v49  }
 0x232   : > { %2875 = vmatpush3.bf16.msra.mxu0 %v2872_v38 }
 0x234   : > { %2018 = vperm.xlu1 %2956, %v1996_v48  }
 0x235   : > { %2023 = vperm.xlu0 %2955, %v1997_v51  }
 0x238   : > { %2028 = vperm.xlu1 %2956, %v1998_v50  }
 0x239   : > { %2033 = vperm.xlu0 %2955, %v1999_v53  }
 0x23c   : > { %2038 = vperm.xlu1 %2956, %v2000_v52  }
 0x23d   : > { %2043 = vperm.xlu0 %2955, %v2001_v55  }
 0x240   : > { %2048 = vperm.xlu1 %2956, %v2002_v54  }
 0x241   : > { %2053 = vperm.xlu0 %2955, %v2003_v57  }
 0x244   : > { %2058 = vperm.xlu1 %2956, %v2004_v56  }
 0x245   : > { %2063 = vperm.xlu0 %2955, %v2005_v62  }
 0x248   : > { %2068 = vperm.xlu1 %2956, %v2006_v61  }
 0x249   : > { %2073 = vperm.xlu0 %2955, %v2007_v3  }
 0x24c   : > { %2078 = vperm.xlu1 %2956, %v2008_v2  }
 0x24d   : > { %2083 = vperm.xlu0 %2955, %v2009_v8  }
 0x250   : > { %2088 = vperm.xlu1 %2956, %v2010_v7  }
 0x266   : > { %v1502_v33 = vpop.trf.xlu0 }
 0x26a   : > { %v1503_v21 = vpop.trf.xlu0 }
 0x26e   : > { %v1504_v27 = vpop.trf.xlu0 }
 0x27f   : > { %v1707_v39 = vpop.permute.xlu1 %1706 }
 0x283   : > { %v1712_v40 = vpop.permute.xlu1 %1711 }
 0x287   : > { %v1717_v41 = vpop.permute.xlu1 %1716 }
 0x28b   : > { %v1722_v42 = vpop.permute.xlu1 %1721 }
 0x28f   : > { %v1752_v43 = vpop.permute.xlu1 %1751 }
 0x293   : > { %v1727_v44 = vpop.permute.xlu1 %1726 }
 0x297   : > { %v1757_v45 = vpop.permute.xlu1 %1756 }
 0x29b   : > { %v1732_v46 = vpop.permute.xlu1 %1731 }
 0x29f   : > { %v1762_v55 = vpop.permute.xlu1 %1761 }
 0x2a3   : > { %v1737_v62 = vpop.permute.xlu1 %1736 }
 0x2e8   : > { %v1275_v28 = vpop.f32.mrb[0].mxu0 }
 0x2e9   : > { %v2696_v29 = vpop.f32.mrb[1].mxu0  ;;  %2735 = vmatprep.mubr.f32.mxu1 %v1275_v28 }
 0x2ea   : > { %v1278_v30 = vpop.f32.mrb[2].mxu0 }
 0x2eb   : > { %v2697_v31 = vpop.f32.mrb[3].mxu0  ;;  %2736 = vmatmul.mubr.f32.vlgmr.msra.gmra.mrb[0].mxu1 %v1278_v30 }
 0x2ec   : > { %2740 = vmatprep.mubr.msk.bf16.mxu1 %vm1510_vm5, %v1502_v33  ;;  %v1505_v31 = vpop.trf.xlu0 }
 0x2f0   : > { %v1506_v32 = vpop.trf.xlu0 }
 0x2f4   : > { %v1507_v33 = vpop.trf.xlu0 }
 0x2f8   : > { %v1508_v34 = vpop.trf.xlu0 }
 0x2fc   : > { %v1509_v35 = vpop.trf.xlu0 }
 0x300   : > { %v1702_v48 = vpop.permute.xlu0 %1701 }
 0x304   : > { %v1742_v0 = vpop.permute.xlu0 %1741 }
 0x308   : > { %v1747_v9 = vpop.permute.xlu0 %1746 }
 0x3be   : > { %v2737_v23 = vpop.f32.mrb[0].mxu1 }
 0x3bf   : > { %v2892_v24 = vadd.f32 %v2737_v23, %v2496_v22  ;;  %v1460_v25 = vpop.f32.mrb[1].mxu1 }
 0x3c0   : > { %v2893_v26 = vadd.f32 %v2496_v22, %v1460_v25 }
 0x3c1   : > { %v1470_v28 = vmax.f32 %v2892_v24, 0.0  ;;  %v2014_v24 = vpop.permute.xlu0 %2013 }
 0x3c2   : > { %v1469_v29 = vmax.f32 %v2893_v26, 0.0 }
 0x3c4   : > { %v1487_v30 = vpack.c.bf16 %v1470_v28, %v1469_v29 }
 0x3c5   : > { %v2024_v26 = vpop.permute.xlu0 %2023 }
 0x3c6   : > { %2738 = vmatprep.subr.bf16.mxu1 %v1487_v30 }
 0x3c7   : > { %2739 = vmatpush3.bf16.msra.mxu1 %v1487_v30 }
 0x3c8   : > { %2876 = vmatprep.subr.bf16.mxu1 %v2844_v60 }
 0x3ca   : > { %2741 = vmatmul.mubr.msk.bf16.vlgmr.msra.gmra.mrb[4].mxu1 %vm1510_vm5, %v1503_v21 }
 0x3cb   : > { %2744 = vmatprep.mubr.msk.bf16.mxu1 %vm1510_vm5, %v1504_v27  ;;  %2884 = vmatpush3.bf16.msra.mxu1 %v2844_v60  ;;  %v3405_v27 = vld [vmem:[%s706_s3] ss:$0 sm:$0xff]  ;;  %s3534_s3 = sld [smem:[#allocation22_spill]] (%p3140_p6) }
 0x3cc   : > { %2877 = vmatprep.subr.bf16.mxu1 %v2848_v1 }
 0x3cf   : > { %2885 = vmatpush3.bf16.msra.mxu1 %v2848_v1 }
 0x3d0   : > { %2878 = vmatprep.subr.bf16.mxu1 %v2852_v6 }
 0x3d1   : > { %s2163_s6 = scalar_lea.vmem (%p3140_p6), %s3534_s3, %s2511_s26 }
 0x3d2   : > { %2745 = vmatmul.mubr.msk.bf16.gmra.mrb[8].mxu1 %vm1510_vm5, %v1505_v31 }
 0x3d3   : > { %2748 = vmatprep.mubr.msk.bf16.mxu1 %vm1510_vm5, %v1506_v32  ;;  %2886 = vmatpush3.bf16.msra.mxu1 %v2852_v6  ;;  %v1767_v6 = vpop.permute.xlu1 %1766  ;;  %v2034_v32 = vpop.permute.xlu0 %2033 }
 0x3d4   : > { %2879 = vmatprep.subr.bf16.mxu1 %v2856_v12 }
 0x3d7   : > { %2887 = vmatpush3.bf16.msra.mxu1 %v2856_v12 }
 0x3d8   : > { %2880 = vmatprep.subr.bf16.mxu1 %v2860_v14 }
 0x3da   : > { %2749 = vmatmul.mubr.msk.bf16.gmra.mrb[12].mxu1 %vm1510_vm5, %v1507_v33 }
 0x3db   : > { %2752 = vmatprep.mubr.msk.bf16.mxu1 %vm1510_vm5, %v1508_v34  ;;  %2888 = vmatpush3.bf16.msra.mxu1 %v2860_v14  ;;  %v1772_v14 = vpop.permute.xlu1 %1771 }
 0x3dc   : > { %2881 = vmatprep.subr.bf16.mxu1 %v2864_v17 }
 0x3df   : > { %2889 = vmatpush3.bf16.msra.mxu1 %v2864_v17  ;;  %v1777_v21 = vpop.permute.xlu1 %1776 }
 0x3e0   : > { %2882 = vmatprep.subr.bf16.mxu1 %v2868_v20 }
 0x3e2   : > { %2753 = vmatmul.mubr.msk.bf16.gmra.mrb[16].mxu1 %vm1510_vm5, %v1509_v35  ;;  %v1980_v35 = vld [vmem:[#allocation2 + $0x8] sm:$0xff] }
 0x3e3   : > { %2890 = vmatpush3.bf16.msra.mxu1 %v2868_v20  ;;  %v2019_v23 = vpop.permute.xlu1 %2018 }
 0x3e4   : > { %2883 = vmatprep.subr.bf16.mxu1 %v2872_v38 }
 0x3e7   : > { %2891 = vmatpush3.bf16.msra.mxu1 %v2872_v38  ;;  %v2029_v25 = vpop.permute.xlu1 %2028 }
 0x3eb   : > { %v2039_v29 = vpop.permute.xlu1 %2038 }
 0x49d   : > { %v2742_v47 = vpop.f32.mrb[4].mxu1 }
 0x49e   : > { %v1569_v49 = vpop.f32.mrb[5].mxu1  ;;  %v1781_v54 = vmul.f32 %v2742_v47, %v1712_v40  ;;  %v2044_v47 = vpop.permute.xlu0 %2043 }
 0x49f   : > { %v1779_v50 = vmul.f32 %v1702_v48, %v1569_v49  ;;  %v2743_v51 = vpop.f32.mrb[6].mxu1  ;;  %v1982_v49 = vld [vmem:[#allocation2 + $0x18] sm:$0xff] }
 0x4a0   : > { %v1572_v52 = vpop.f32.mrb[7].mxu1  ;;  %v1782_v56 = vmul.f32 %v2743_v51, %v1717_v41 }
 0x4a1   : > { %v1780_v53 = vmul.f32 %v1707_v39, %v1572_v52  ;;  %2788 = vmatprep.mubr.f32.mxu0 %v1779_v50  ;;  %v1979_v39 = vld [vmem:[#allocation2] sm:$0xff] }
 0x4a3   : > { %2789 = vmatmul.mubr.f32.vlgmr.msra.gmra.mrb[4].mxu0 %v1780_v53  ;;  %v1981_v53 = vld [vmem:[#allocation2 + $0x10] sm:$0xff] }
 0x4a4   : > { %2791 = vmatprep.mubr.f32.mxu0 %v1781_v54 }
 0x4a5   : > { %v2746_v57 = vpop.f32.mrb[8].mxu1 }
 0x4a6   : > { %v1585_v58 = vpop.f32.mrb[9].mxu1  ;;  %v1785_v1 = vmul.f32 %v2746_v57, %v1732_v46 }
 0x4a7   : > { %v1783_v59 = vmul.f32 %v1722_v42, %v1585_v58  ;;  %v2747_v60 = vpop.f32.mrb[10].mxu1  ;;  %2792 = vmatmul.mubr.f32.gmra.mrb[6].mxu0 %v1782_v56 }
 0x4a8   : > { %v1588_v61 = vpop.f32.mrb[11].mxu1  ;;  %v1786_v2 = vmul.f32 %v2747_v60, %v1737_v62 }
 0x4a9   : > { %v1784_v63 = vmul.f32 %v1727_v44, %v1588_v61  ;;  %2794 = vmatprep.mubr.f32.mxu0 %v1783_v59  ;;  %v2049_v44 = vpop.permute.xlu1 %2048  ;;  %v1984_v61 = vld [vmem:[#allocation2 + $0x28] sm:$0xff] }
 0x4ab   : > { %2795 = vmatmul.mubr.f32.gmra.mrb[8].mxu0 %v1784_v63 }
 0x4ac   : > { %2797 = vmatprep.mubr.f32.mxu0 %v1785_v1 }
 0x4ad   : > { %v2750_v3 = vpop.f32.mrb[12].mxu1 }
 0x4ae   : > { %v1789_v4 = vmul.f32 %v2750_v3, %v1752_v43  ;;  %v1601_v5 = vpop.f32.mrb[13].mxu1 }
 0x4af   : > { %v1787_v7 = vmul.f32 %v1742_v0, %v1601_v5  ;;  %v2751_v8 = vpop.f32.mrb[14].mxu1  ;;  %2798 = vmatmul.mubr.f32.gmra.mrb[10].mxu0 %v1786_v2  ;;  %v2059_v0 = vpop.permute.xlu1 %2058  ;;  %v1983_v2 = vld [vmem:[#allocation2 + $0x20] sm:$0xff] }
 0x4b0   : > { %v1790_v10 = vmul.f32 %v2751_v8, %v1757_v45  ;;  %v1604_v11 = vpop.f32.mrb[15].mxu1  ;;  %2803 = vmatprep.mubr.f32.mxu1 %v1789_v4  ;;  %v2054_v5 = vpop.permute.xlu0 %2053 }
 0x4b1   : > { %v1788_v12 = vmul.f32 %v1747_v9, %v1604_v11  ;;  %2800 = vmatprep.mubr.f32.mxu0 %v1787_v7 }
 0x4b2   : > { %2804 = vmatmul.mubr.f32.vlgmr.msra.gmra.mrb[2].mxu1 %v1790_v10 }
 0x4b3   : > { %2801 = vmatmul.mubr.f32.gmra.mrb[12].mxu0 %v1788_v12  ;;  %v1986_v12 = vld [vmem:[#allocation2 + $0x38] sm:$0xff] }
 0x4b5   : > { %v2754_v13 = vpop.f32.mrb[16].mxu1 }
 0x4b6   : > { %v1617_v15 = vpop.f32.mrb[17].mxu1  ;;  %v1793_v20 = vmul.f32 %v2754_v13, %v1772_v14 }
 0x4b7   : > { %v1791_v16 = vmul.f32 %v1762_v55, %v1617_v15  ;;  %v2755_v17 = vpop.f32.mrb[18].mxu1 }
 0x4b8   : > { %v1620_v18 = vpop.f32.mrb[19].mxu1  ;;  %v1794_v22 = vmul.f32 %v2755_v17, %v1777_v21 }
 0x4b9   : > { %v1792_v19 = vmul.f32 %v1767_v6, %v1620_v18  ;;  %2806 = vmatprep.mubr.f32.mxu1 %v1791_v16  ;;  %v1985_v18 = vld [vmem:[#allocation2 + $0x30] sm:$0xff] }
 0x4bb   : > { %2807 = vmatmul.mubr.f32.gmra.mrb[20].mxu1 %v1792_v19 }
 0x4bc   : > { %2809 = vmatprep.mubr.f32.mxu1 %v1793_v20 }
 0x4bf   : > { %2810 = vmatmul.mubr.f32.gmra.mrb[22].mxu1 %v1794_v22 }
 0x576   : > { %v2790_v28 = vpop.f32.mrb[4].mxu0 }
 0x577   : > { %v1890_v30 = vadd.f32 %v2790_v28, %v3405_v27  ;;  %v1884_v31 = vpop.f32.mrb[5].mxu0  ;;  %v1990_v28 = vld [vmem:[#allocation2 + $0x58] sm:$0xff] }
 0x578   : > { %v1885_v33 = vadd.f32 %v3405_v27, %v1884_v31  ;;  %v2064_v31 = vpop.permute.xlu0 %2063 }
 0x579   : > { %v1964_v34 = vmax.f32 %v1890_v30, 0.0 }
 0x57a   : > { %v1963_v36 = vmax.f32 %v1885_v33, 0.0  ;;  %v2793_v37 = vpop.f32.mrb[6].mxu0 }
 0x57b   : > { %v2092_v38 = vmul.f32 %v2019_v23, %v1964_v34  ;;  %v1900_v40 = vadd.f32 %v2793_v37, %v3405_v27  ;;  %v1894_v41 = vpop.f32.mrb[7].mxu0  ;;  %v1988_v34 = vld [vmem:[#allocation2 + $0x48] sm:$0xff] }
 0x57c   : > { %v2091_v42 = vmul.f32 %v2014_v24, %v1963_v36  ;;  %v1895_v43 = vadd.f32 %v3405_v27, %v1894_v41 }
 0x57d   : > { %v2108_v45 = vadd.f32 %v2092_v38, %v1980_v35  ;;  %v1966_v46 = vmax.f32 %v1900_v40, 0.0  ;;  %v1989_v35 = vld [vmem:[#allocation2 + $0x50] sm:$0xff] }
 0x57e   : > { %v2107_v48 = vadd.f32 %v2091_v42, %v1979_v39  ;;  %v1965_v50 = vmax.f32 %v1895_v43, 0.0  ;;  %v2796_v51 = vpop.f32.mrb[8].mxu0  ;;  %v1987_v39 = vld [vmem:[#allocation2 + $0x40] sm:$0xff] }
 0x57f   : > { %2124 = vst [vmem:[#allocation3 + $0x8] sm:$0xff] %v2108_v45  ;;  %2140 = vst [vmem:[%s3203_s5 + $0x8] sm:$0xff] %v2108_v45  ;;  %v2094_v52 = vmul.f32 %v2029_v25, %v1966_v46  ;;  %v1910_v54 = vadd.f32 %v2796_v51, %v3405_v27  ;;  %v1904_v55 = vpop.f32.mrb[9].mxu0  ;;  %v2069_v25 = vpop.permute.xlu1 %2068 }
 0x580   : > { %2123 = vst [vmem:[#allocation3] sm:$0xff] %v2107_v48  ;;  %2139 = vst [vmem:[%s3203_s5] sm:$0xff] %v2107_v48  ;;  %v2093_v56 = vmul.f32 %v2024_v26, %v1965_v50  ;;  %v1905_v57 = vadd.f32 %v3405_v27, %v1904_v55  ;;  %v2074_v50 = vpop.permute.xlu0 %2073 }
 0x581   : > { %v2110_v58 = vadd.f32 %v2094_v52, %v1982_v49  ;;  %v1968_v59 = vmax.f32 %v1910_v54, 0.0  ;;  %v1992_v52 = vld [vmem:[#allocation2 + $0x68] sm:$0xff] }
 0x582   : > { %v2109_v60 = vadd.f32 %v2093_v56, %v1981_v53  ;;  %v1967_v62 = vmax.f32 %v1905_v57, 0.0  ;;  %v2799_v63 = vpop.f32.mrb[10].mxu0  ;;  %v1991_v56 = vld [vmem:[#allocation2 + $0x60] sm:$0xff] }
 0x583   : > { %2126 = vst [vmem:[#allocation3 + $0x18] sm:$0xff] %v2110_v58  ;;  %2142 = vst [vmem:[%s3203_s5 + $0x18] sm:$0xff] %v2110_v58  ;;  %v2096_v1 = vmul.f32 %v2039_v29, %v1968_v59  ;;  %v1920_v3 = vadd.f32 %v2799_v63, %v3405_v27  ;;  %v1914_v4 = vpop.f32.mrb[11].mxu0  ;;  %v2079_v48 = vpop.permute.xlu1 %2078 }
 0x584   : > { %2125 = vst [vmem:[#allocation3 + $0x10] sm:$0xff] %v2109_v60  ;;  %2141 = vst [vmem:[%s3203_s5 + $0x10] sm:$0xff] %v2109_v60  ;;  %v2095_v6 = vmul.f32 %v2034_v32, %v1967_v62  ;;  %v1915_v7 = vadd.f32 %v3405_v27, %v1914_v4 }
 0x585   : > { %v2112_v8 = vadd.f32 %v2096_v1, %v1984_v61  ;;  %v1970_v9 = vmax.f32 %v1920_v3, 0.0  ;;  %v2805_v10 = vpop.f32.mrb[2].mxu1  ;;  %v1994_v1 = vld [vmem:[#allocation2 + $0x78] sm:$0xff]  ;;  %v2084_v3 = vpop.permute.xlu0 %2083 }
 0x586   : > { %v2111_v11 = vadd.f32 %v2095_v6, %v1983_v2  ;;  %v1969_v13 = vmax.f32 %v1915_v7, 0.0  ;;  %v1940_v14 = vadd.f32 %v2805_v10, %v3405_v27  ;;  %v2802_v15 = vpop.f32.mrb[12].mxu0  ;;  %v1934_v16 = vpop.f32.mrb[3].mxu1 }
 0x587   : > { %2128 = vst [vmem:[#allocation3 + $0x28] sm:$0xff] %v2112_v8  ;;  %2144 = vst [vmem:[%s3203_s5 + $0x28] sm:$0xff] %v2112_v8  ;;  %v2098_v17 = vmul.f32 %v2049_v44, %v1970_v9  ;;  %v1930_v19 = vadd.f32 %v2802_v15, %v3405_v27  ;;  %v1935_v20 = vadd.f32 %v3405_v27, %v1934_v16  ;;  %v1924_v21 = vpop.f32.mrb[13].mxu0  ;;  %v2089_v63 = vpop.permute.xlu1 %2088  ;;  %v2223_v9 = vld [vmem:[%s3203_s5 + $0x8] sm:$0xff] (%p3140_p6) }
 0x588   : > { %2127 = vst [vmem:[#allocation3 + $0x20] sm:$0xff] %v2111_v11  ;;  %2143 = vst [vmem:[%s3203_s5 + $0x20] sm:$0xff] %v2111_v11  ;;  %v2097_v22 = vmul.f32 %v2044_v47, %v1969_v13  ;;  %v1974_v23 = vmax.f32 %v1940_v14, 0.0  ;;  %v1925_v24 = vadd.f32 %v3405_v27, %v1924_v21 }
 0x589   : > { %v2114_v26 = vadd.f32 %v2098_v17, %v1986_v12  ;;  %v1972_v29 = vmax.f32 %v1930_v19, 0.0  ;;  %v1973_v30 = vmax.f32 %v1935_v20, 0.0  ;;  %2224 = vst [vmem:[%s2163_s6 + $0x10] sm:$0xff] (%p3140_p6), %v2223_v9 }
 0x58a   : > { %v2113_v32 = vadd.f32 %v2097_v22, %v1985_v18  ;;  %v2102_v33 = vmul.f32 %v2069_v25, %v1974_v23  ;;  %v1971_v36 = vmax.f32 %v1925_v24, 0.0  ;;  %v2227_v11 = vld [vmem:[%s3203_s5 + $0x18] sm:$0xff] (%p3140_p6) }
 0x58b   : > { %2130 = vst [vmem:[#allocation3 + $0x38] sm:$0xff] %v2114_v26  ;;  %2146 = vst [vmem:[%s3203_s5 + $0x38] sm:$0xff] %v2114_v26  ;;  %v2100_v37 = vmul.f32 %v2059_v0, %v1972_v29  ;;  %v2101_v38 = vmul.f32 %v2064_v31, %v1973_v30  ;;  %v2225_v10 = vld [vmem:[%s3203_s5 + $0x10] sm:$0xff] (%p3140_p6) }
 0x58c   : > { %2129 = vst [vmem:[#allocation3 + $0x30] sm:$0xff] %v2113_v32  ;;  %2145 = vst [vmem:[%s3203_s5 + $0x30] sm:$0xff] %v2113_v32  ;;  %v2118_v40 = vadd.f32 %v2102_v33, %v1990_v28  ;;  %v2099_v41 = vmul.f32 %v2054_v5, %v1971_v36  ;;  %v1993_v5 = vld [vmem:[#allocation2 + $0x70] sm:$0xff] }
 0x58d   : > { %v2116_v42 = vadd.f32 %v2100_v37, %v1988_v34  ;;  %v2117_v43 = vadd.f32 %v2101_v38, %v1989_v35  ;;  %2226 = vst [vmem:[%s2163_s6 + $0x20] sm:$0xff] (%p3140_p6), %v2225_v10  ;;  %2228 = vst [vmem:[%s2163_s6 + $0x30] sm:$0xff] (%p3140_p6), %v2227_v11 }
 0x58e   : > { %2134 = vst [vmem:[#allocation3 + $0x58] sm:$0xff] %v2118_v40  ;;  %2150 = vst [vmem:[%s3203_s5 + $0x58] sm:$0xff] %v2118_v40  ;;  %v2115_v44 = vadd.f32 %v2099_v41, %v1987_v39  ;;  %v2808_v45 = vpop.f32.mrb[20].mxu1  ;;  %v2231_v13 = vld [vmem:[%s3203_s5 + $0x28] sm:$0xff] (%p3140_p6) }
 0x58f   : > { %2132 = vst [vmem:[#allocation3 + $0x48] sm:$0xff] %v2116_v42  ;;  %2148 = vst [vmem:[%s3203_s5 + $0x48] sm:$0xff] %v2116_v42  ;;  %v1950_v46 = vadd.f32 %v2808_v45, %v3405_v27  ;;  %v1944_v47 = vpop.f32.mrb[21].mxu1  ;;  %v2229_v12 = vld [vmem:[%s3203_s5 + $0x20] sm:$0xff] (%p3140_p6) }
 0x590   : > { %2133 = vst [vmem:[#allocation3 + $0x50] sm:$0xff] %v2117_v43  ;;  %2149 = vst [vmem:[%s3203_s5 + $0x50] sm:$0xff] %v2117_v43  ;;  %v1945_v49 = vadd.f32 %v3405_v27, %v1944_v47 }
 0x591   : > { %2131 = vst [vmem:[#allocation3 + $0x40] sm:$0xff] %v2115_v44  ;;  %2147 = vst [vmem:[%s3203_s5 + $0x40] sm:$0xff] %v2115_v44  ;;  %v1976_v51 = vmax.f32 %v1950_v46, 0.0 }
 0x592   : > { %v1975_v53 = vmax.f32 %v1945_v49, 0.0  ;;  %v2811_v54 = vpop.f32.mrb[22].mxu1  ;;  %2230 = vst [vmem:[%s2163_s6 + $0x40] sm:$0xff] (%p3140_p6), %v2229_v12  ;;  %2232 = vst [vmem:[%s2163_s6 + $0x50] sm:$0xff] (%p3140_p6), %v2231_v13  ;;  %v2235_v15 = vld [vmem:[%s3203_s5 + $0x38] sm:$0xff] (%p3140_p6) }
 0x593   : > { %v2104_v55 = vmul.f32 %v2079_v48, %v1976_v51  ;;  %v1960_v57 = vadd.f32 %v2811_v54, %v3405_v27  ;;  %v1954_v58 = vpop.f32.mrb[23].mxu1  ;;  %v2233_v14 = vld [vmem:[%s3203_s5 + $0x30] sm:$0xff] (%p3140_p6)  ;;  %2236 = vst [vmem:[%s2163_s6 + $0x70] sm:$0xff] (%p3140_p6), %v2235_v15 }
 0x594   : > { %v2103_v59 = vmul.f32 %v2074_v50, %v1975_v53  ;;  %v1955_v60 = vadd.f32 %v3405_v27, %v1954_v58  ;;  %v2221_v27 = vld [vmem:[%s3203_s5] sm:$0xff] (%p3140_p6)  ;;  %2234 = vst [vmem:[%s2163_s6 + $0x60] sm:$0xff] (%p3140_p6), %v2233_v14 }
 0x595   : > { %v2120_v61 = vadd.f32 %v2104_v55, %v1992_v52  ;;  %v1978_v62 = vmax.f32 %v1960_v57, 0.0  ;;  %2222 = vst [vmem:[%s2163_s6] sm:$0xff] (%p3140_p6), %v2221_v27  ;;  %v2243_v19 = vld [vmem:[%s3203_s5 + $0x58] sm:$0xff] (%p3140_p6) }
 0x596   : > { %v2119_v0 = vadd.f32 %v2103_v59, %v1991_v56  ;;  %v1977_v2 = vmax.f32 %v1955_v60, 0.0  ;;  %2161 = sbr.rel (!%p3140_p6) target bundleno = 1445 (0x5a5), region = 96  ;;  %v2239_v17 = vld [vmem:[%s3203_s5 + $0x48] sm:$0xff] (%p3140_p6)  ;;  %2244 = vst [vmem:[%s2163_s6 + $0xb0] sm:$0xff] (%p3140_p6), %v2243_v19 }
 0x597   : > { %2136 = vst [vmem:[#allocation3 + $0x68] sm:$0xff] %v2120_v61  ;;  %2152 = vst [vmem:[%s3203_s5 + $0x68] sm:$0xff] %v2120_v61  ;;  %v2106_v4 = vmul.f32 %v2089_v63, %v1978_v62  ;;  %v2241_v18 = vld [vmem:[%s3203_s5 + $0x50] sm:$0xff] (%p3140_p6) }
 0x598   : > { %2135 = vst [vmem:[#allocation3 + $0x60] sm:$0xff] %v2119_v0  ;;  %2151 = vst [vmem:[%s3203_s5 + $0x60] sm:$0xff] %v2119_v0  ;;  %v2105_v6 = vmul.f32 %v2084_v3, %v1977_v2  ;;  %v2237_v16 = vld [vmem:[%s3203_s5 + $0x40] sm:$0xff] (%p3140_p6) }
 0x599   : > { %v2122_v7 = vadd.f32 %v2106_v4, %v1994_v1  ;;  %2238 = vst [vmem:[%s2163_s6 + $0x80] sm:$0xff] (%p3140_p6), %v2237_v16  ;;  %2240 = vst [vmem:[%s2163_s6 + $0x90] sm:$0xff] (%p3140_p6), %v2239_v17 }
 0x59a   : > { %v2121_v8 = vadd.f32 %v2105_v6, %v1993_v5  ;;  %2242 = vst [vmem:[%s2163_s6 + $0xa0] sm:$0xff] (%p3140_p6), %v2241_v18 }
 0x59b   : > { %2138 = vst [vmem:[#allocation3 + $0x78] sm:$0xff] %v2122_v7  ;;  %2154 = vst [vmem:[%s3203_s5 + $0x78] sm:$0xff] %v2122_v7 }
 0x59c   : > { %2137 = vst [vmem:[#allocation3 + $0x70] sm:$0xff] %v2121_v8  ;;  %2153 = vst [vmem:[%s3203_s5 + $0x70] sm:$0xff] %v2121_v8 }
 0x59e   : > { %v2247_v21 = vld [vmem:[%s3203_s5 + $0x68] sm:$0xff] }
 0x59f   : > { %v2245_v20 = vld [vmem:[%s3203_s5 + $0x60] sm:$0xff]  ;;  %2248 = vst [vmem:[%s2163_s6 + $0xd0] sm:$0xff] %v2247_v21 }
 0x5a0   : > { %2246 = vst [vmem:[%s2163_s6 + $0xc0] sm:$0xff] %v2245_v20 }
 0x5a2   : > { %v2251_v23 = vld [vmem:[%s3203_s5 + $0x78] sm:$0xff] }
 0x5a3   : > { %v2249_v22 = vld [vmem:[%s3203_s5 + $0x70] sm:$0xff]  ;;  %2252 = vst [vmem:[%s2163_s6 + $0xf0] sm:$0xff] %v2251_v23 }
 0x5a4   : > { %2250 = vst [vmem:[%s2163_s6 + $0xe0] sm:$0xff] %v2249_v22 }
 0x5a5 PF: > { %s3535_s30 = sld [smem:[#allocation10_spill]]  ;;  %s3536_s18 = sld [smem:[#allocation6_spill]] }
 0x5a6   : > { %s3537_s19 = sld [smem:[#allocation14_spill]]  ;;  %s3538_s20 = sld [smem:[#allocation8_spill]] }
 0x5a7   : > { %s3539_s21 = sld [smem:[#allocation9_spill]]  ;;  %s3540_s22 = sld [smem:[#allocation11_spill]] }
 0x5a8   : > { %s3541_s23 = sld [smem:[#allocation13_spill]] }
 0x5ab   : > { %s25_s24 = sadd.s32 1, %s3535_s30  }
 0x5ac   : > { %p22_p11 = scmp.ge.s32.totalorder %s25_s24, 6  }
 0x5ae   :  { %24 = sbr.rel (!%p22_p11) target bundleno = 13 (0xd), region = 187 }

</bundles_post_ra>
